<compile_context>
chip_gen: v5e
topology: v5e:2x2
jax: 0.10.0
libtpu: 0.0.40
codegen_flags: <defaults>
</compile_context>

<pallas_src>
import functools

import jax
import jax.numpy as jnp
from jax import lax
from jax.experimental import pallas as pl
from jax.experimental.pallas import tpu as pltpu

_NEG_BIG = -1e30  # softmax mask value for padded cluster columns


# --------------------------- fused forward kernel ----------------------------
def _fused_kernel(x_ref, adj_ref, w1_ref, b1_ref, w2_ref, b2_ref, mu0_ref,
                  mu_out_ref, r_out_ref, emb_out_ref, dist_out_ref,
                  *, k, cluster_temp, num_iter):
    f32 = jnp.float32

    # ---- GCN layer 1: relu(adj @ (x @ W1) + b1) ----
    h = jnp.dot(x_ref[...], w1_ref[...], preferred_element_type=f32)
    h = jnp.dot(adj_ref[...], h, preferred_element_type=f32) + b1_ref[...]
    h = jnp.maximum(h, 0.0)
    # (dropout = identity in eval mode)

    # ---- GCN layer 2: adj @ (h @ W2) + b2 ----
    e = jnp.dot(h, w2_ref[...], preferred_element_type=f32)
    embeds = jnp.dot(adj_ref[...], e, preferred_element_type=f32) + b2_ref[...]
    emb_out_ref[...] = embeds.astype(emb_out_ref.dtype)

    # ---- row L2-normalization (rsqrt -> EUP, single fused pass) ----
    inv_norm = lax.rsqrt(jnp.sum(embeds * embeds, axis=1, keepdims=True))
    data = embeds * inv_norm                                       # [N, D]

    n, d = data.shape
    kp = mu0_ref.shape[0]                                          # padded K (lane-dense)

    # masks selecting the real (un-padded) cluster columns
    col_mask = lax.broadcasted_iota(jnp.int32, (n, kp), 1) < k     # [N, KP]
    kmask_row = lax.broadcasted_iota(jnp.int32, (1, kp), 1) < k    # [1, KP]

    def soft_assign(mu):
        # dist = data @ mu.T  (contract feature dim; no materialized transpose)
        dist = lax.dot_general(data, mu, (((1,), (1,)), ((), ())),
                               preferred_element_type=f32)         # [N, KP]
        z = cluster_temp * dist
        z = jnp.where(col_mask, z, _NEG_BIG)
        z = z - jnp.max(z, axis=1, keepdims=True)
        ez = jnp.exp(z)
        r = ez * pl.reciprocal(jnp.sum(ez, axis=1, keepdims=True), approx=False)
        return dist, r

    # soft-kmeans: num_iter updates (first cluster() call) + 1 update (second call)
    mu = mu0_ref[...]
    for _ in range(num_iter + 1):
        _, r = soft_assign(mu)
        cluster_r = jnp.sum(r, axis=0, keepdims=True)              # [1, KP]
        cluster_r = jnp.where(kmask_row, cluster_r, 1.0)           # guard empty padded cols
        r_scaled = r * pl.reciprocal(cluster_r, approx=False)
        # mu = (r / cluster_r).T @ data  ==  (r.T @ data) / cluster_r[:, None]
        mu = lax.dot_general(r_scaled, data, (((0,), (0,)), ((), ())),
                             preferred_element_type=f32)           # [KP, D]

    # final assignment with the updated mu
    dist, r = soft_assign(mu)
    mu_out_ref[...] = mu.astype(mu_out_ref.dtype)
    r_out_ref[...] = r.astype(r_out_ref.dtype)
    dist_out_ref[...] = dist.astype(dist_out_ref.dtype)


# ------------------------------- full forward --------------------------------
def gcn_clusternet_forward(x, adj, params, cluster_temp, num_iter=1, k_pad=128):
    n, nfeat = x.shape
    nhid = params["w1"].shape[1]
    nout = params["w2"].shape[1]
    k = params["init"].shape[0]
    kp = max(int(k_pad), k)

    # hoist tiny reshapes / padding out of the kernel (done once at trace time)
    b1 = params["b1"].reshape(1, nhid)
    b2 = params["b2"].reshape(1, nout)
    mu0 = jnp.zeros((kp, nout), jnp.float32).at[:k].set(params["init"])

    vmem = pl.BlockSpec(memory_space=pltpu.MemorySpace.VMEM)

    # advisory cost estimate for the XLA scheduler
    n_assign = num_iter + 2                      # num_iter + 1 updates + final assign
    flops = (2 * n * nfeat * nhid + 2 * n * n * nhid          # GCN layer 1
             + 2 * n * nhid * nout + 2 * n * n * nout         # GCN layer 2
             + n_assign * 2 * n * nout * kp                   # dist matmuls
             + (num_iter + 1) * 2 * n * nout * kp)            # centroid matmuls
    transcendentals = n_assign * n * kp + n
    bytes_accessed = 4 * (x.size + adj.size
                          + params["w1"].size + nhid + params["w2"].size + nout
                          + kp * nout                         # mu0 in
                          + kp * nout + 2 * n * kp + n * nout)  # outputs

    kernel = functools.partial(_fused_kernel, k=k,
                               cluster_temp=float(cluster_temp),
                               num_iter=int(num_iter))

    mu_pad, r_pad, embeds, dist_pad = pl.pallas_call(
        kernel,
        out_shape=(
            jax.ShapeDtypeStruct((kp, nout), jnp.float32),    # mu (padded rows)
            jax.ShapeDtypeStruct((n, kp), jnp.float32),       # r  (lane-dense)
            jax.ShapeDtypeStruct((n, nout), jnp.float32),     # embeds
            jax.ShapeDtypeStruct((n, kp), jnp.float32),       # dist (lane-dense)
        ),
        in_specs=[vmem] * 7,
        out_specs=(vmem, vmem, vmem, vmem),
        cost_estimate=pl.CostEstimate(flops=flops,
                                      transcendentals=transcendentals,
                                      bytes_accessed=bytes_accessed),
    )(x, adj, params["w1"], b1, params["w2"], b2, mu0)

    return mu_pad[:k], r_pad[:, :k], embeds, dist_pad[:, :k]


# ----------------------------------- main ------------------------------------
if __name__ == "__main__":
    N = 64          # number of nodes
    NFEAT = 16
    NHID = 32
    NOUT = 32
    K = 5
    CLUSTER_TEMP = 50.0

    key = jax.random.PRNGKey(0)
    kx, ka, kw1, kb1, kw2, kb2, kinit = jax.random.split(key, 7)

    # node features
    x = jax.random.normal(kx, (N, NFEAT), dtype=jnp.float32)

    # deterministic dense "normalized adjacency": symmetric 0/1 + self-loops, row-normalized
    a = (jax.random.uniform(ka, (N, N)) < 0.1).astype(jnp.float32)
    a = jnp.maximum(a, a.T) + jnp.eye(N, dtype=jnp.float32)
    adj = a / jnp.sum(a, axis=1, keepdims=True)

    # GCN parameters (uniform init like pygcn's GraphConvolution reset_parameters)
    stdv1 = 1.0 / (NHID ** 0.5)
    stdv2 = 1.0 / (NOUT ** 0.5)
    params = {
        "w1": jax.random.uniform(kw1, (NFEAT, NHID), minval=-stdv1, maxval=stdv1, dtype=jnp.float32),
        "b1": jax.random.uniform(kb1, (NHID,), minval=-stdv1, maxval=stdv1, dtype=jnp.float32),
        "w2": jax.random.uniform(kw2, (NHID, NOUT), minval=-stdv2, maxval=stdv2, dtype=jnp.float32),
        "b2": jax.random.uniform(kb2, (NOUT,), minval=-stdv2, maxval=stdv2, dtype=jnp.float32),
        # self.init = torch.rand(K, nout)
        "init": jax.random.uniform(kinit, (K, NOUT), dtype=jnp.float32),
    }
    # NOTE: self.distmult / sigmoid are initialized in __init__ but unused in forward.

    mu, r, embeds, dist = gcn_clusternet_forward(x, adj, params, CLUSTER_TEMP, num_iter=1)
    jax.block_until_ready((mu, r, embeds, dist))

    assert mu.shape == (K, NOUT)
    assert r.shape == (N, K)
    assert embeds.shape == (N, NOUT)
    assert dist.shape == (N, K)
    assert bool(jnp.all(jnp.isfinite(mu))) and bool(jnp.all(jnp.isfinite(r)))
    print("KERNEL_OK")
</pallas_src>

<mosaic_0001>
module attributes {stable_mosaic.version = 11 : i64} {
  func.func @_fused_kernel(%arg0: memref<64x16xf32, #tpu.memory_space<vmem>>, %arg1: memref<64x64xf32, #tpu.memory_space<vmem>>, %arg2: memref<16x32xf32, #tpu.memory_space<vmem>>, %arg3: memref<1x32xf32, #tpu.memory_space<vmem>>, %arg4: memref<32x32xf32, #tpu.memory_space<vmem>>, %arg5: memref<1x32xf32, #tpu.memory_space<vmem>>, %arg6: memref<128x32xf32, #tpu.memory_space<vmem>>, %arg7: memref<128x32xf32, #tpu.memory_space<vmem>>, %arg8: memref<64x128xf32, #tpu.memory_space<vmem>>, %arg9: memref<64x32xf32, #tpu.memory_space<vmem>>, %arg10: memref<64x128xf32, #tpu.memory_space<vmem>>) attributes {dimension_semantics = [], scalar_prefetch = 0 : i64, scratch_operands = 0 : i64, tpu.core_type = #tpu.core_type<tc>} {
    %c0 = arith.constant 0 : index
    %c0_0 = arith.constant 0 : index
    %0 = vector.load %arg0[%c0, %c0_0] : memref<64x16xf32, #tpu.memory_space<vmem>>, vector<64x16xf32>
    %c0_1 = arith.constant 0 : index
    %c0_2 = arith.constant 0 : index
    %1 = vector.load %arg2[%c0_1, %c0_2] : memref<16x32xf32, #tpu.memory_space<vmem>>, vector<16x32xf32>
    %cst = arith.constant dense<0.000000e+00> : vector<64x32xf32>
    %2 = tpu.matmul %0, %1, %cst {dimension_numbers = #tpu.dot_dimension_numbers<[1], [0], [0], [1], [0, 0, 1, 1], [], []>} : vector<64x16xf32>, vector<16x32xf32>, vector<64x32xf32> -> vector<64x32xf32>
    %c0_3 = arith.constant 0 : index
    %c0_4 = arith.constant 0 : index
    %3 = vector.load %arg1[%c0_3, %c0_4] : memref<64x64xf32, #tpu.memory_space<vmem>>, vector<64x64xf32>
    %cst_5 = arith.constant dense<0.000000e+00> : vector<64x32xf32>
    %4 = tpu.matmul %3, %2, %cst_5 {dimension_numbers = #tpu.dot_dimension_numbers<[1], [0], [0], [1], [0, 0, 1, 1], [], []>} : vector<64x64xf32>, vector<64x32xf32>, vector<64x32xf32> -> vector<64x32xf32>
    %c0_6 = arith.constant 0 : index
    %c0_7 = arith.constant 0 : index
    %5 = vector.load %arg3[%c0_6, %c0_7] : memref<1x32xf32, #tpu.memory_space<vmem>>, vector<1x32xf32>
    %6 = vector.broadcast %5 : vector<1x32xf32> to vector<64x32xf32>
    %7 = arith.addf %4, %6 : vector<64x32xf32>
    %cst_8 = arith.constant 0.000000e+00 : f32
    %8 = vector.broadcast %cst_8 : f32 to vector<64x32xf32>
    %9 = arith.maximumf %7, %8 : vector<64x32xf32>
    %c0_9 = arith.constant 0 : index
    %c0_10 = arith.constant 0 : index
    %10 = vector.load %arg4[%c0_9, %c0_10] : memref<32x32xf32, #tpu.memory_space<vmem>>, vector<32x32xf32>
    %cst_11 = arith.constant dense<0.000000e+00> : vector<64x32xf32>
    %11 = tpu.matmul %9, %10, %cst_11 {dimension_numbers = #tpu.dot_dimension_numbers<[1], [0], [0], [1], [0, 0, 1, 1], [], []>} : vector<64x32xf32>, vector<32x32xf32>, vector<64x32xf32> -> vector<64x32xf32>
    %c0_12 = arith.constant 0 : index
    %c0_13 = arith.constant 0 : index
    %12 = vector.load %arg1[%c0_12, %c0_13] : memref<64x64xf32, #tpu.memory_space<vmem>>, vector<64x64xf32>
    %cst_14 = arith.constant dense<0.000000e+00> : vector<64x32xf32>
    %13 = tpu.matmul %12, %11, %cst_14 {dimension_numbers = #tpu.dot_dimension_numbers<[1], [0], [0], [1], [0, 0, 1, 1], [], []>} : vector<64x64xf32>, vector<64x32xf32>, vector<64x32xf32> -> vector<64x32xf32>
    %c0_15 = arith.constant 0 : index
    %c0_16 = arith.constant 0 : index
    %14 = vector.load %arg5[%c0_15, %c0_16] : memref<1x32xf32, #tpu.memory_space<vmem>>, vector<1x32xf32>
    %15 = vector.broadcast %14 : vector<1x32xf32> to vector<64x32xf32>
    %16 = arith.addf %13, %15 : vector<64x32xf32>
    %c0_17 = arith.constant 0 : index
    %c0_18 = arith.constant 0 : index
    %17 = vector.load %arg9[%c0_17, %c0_18] : memref<64x32xf32, #tpu.memory_space<vmem>>, vector<64x32xf32>
    tpu.vector_store %arg9[%c0_17, %c0_18], %16 {strides = array<i32>} : memref<64x32xf32, #tpu.memory_space<vmem>>, vector<64x32xf32>,
    %18 = arith.mulf %16, %16 : vector<64x32xf32>
    %cst_19 = arith.constant dense<0.000000e+00> : vector<64xf32>
    %19 = vector.multi_reduction <add>, %18, %cst_19 [1] : vector<64x32xf32> to vector<64xf32>
    %20 = vector.shape_cast %19 : vector<64xf32> to vector<64x1xf32>
    %21 = math.rsqrt %20 : vector<64x1xf32>
    %22 = vector.broadcast %21 : vector<64x1xf32> to vector<64x32xf32>
    %23 = arith.mulf %16, %22 : vector<64x32xf32>
    %24 = tpu.iota {dimensions = array<i32: 1>} : vector<64x128xi32>
    %c5_i32 = arith.constant 5 : i32
    %25 = vector.broadcast %c5_i32 : i32 to vector<64x128xi32>
    %26 = arith.cmpi slt, %24, %25 : vector<64x128xi32>
    %27 = tpu.iota {dimensions = array<i32: 1>} : vector<1x128xi32>
    %c5_i32_20 = arith.constant 5 : i32
    %28 = vector.broadcast %c5_i32_20 : i32 to vector<1x128xi32>
    %29 = arith.cmpi slt, %27, %28 : vector<1x128xi32>
    %c0_21 = arith.constant 0 : index
    %c0_22 = arith.constant 0 : index
    %30 = vector.load %arg6[%c0_21, %c0_22] : memref<128x32xf32, #tpu.memory_space<vmem>>, vector<128x32xf32>
    %cst_23 = arith.constant dense<0.000000e+00> : vector<64x128xf32>
    %31 = tpu.matmul %23, %30, %cst_23 {dimension_numbers = #tpu.dot_dimension_numbers<[1], [1], [0], [0], [0, 0, 1, 0], [], []>} : vector<64x32xf32>, vector<128x32xf32>, vector<64x128xf32> -> vector<64x128xf32>
    %cst_24 = arith.constant 5.000000e+01 : f32
    %32 = vector.broadcast %cst_24 : f32 to vector<64x128xf32>
    %33 = arith.mulf %32, %31 : vector<64x128xf32>
    %cst_25 = arith.constant -1.000000e+30 : f32
    %34 = vector.broadcast %cst_25 : f32 to vector<64x128xf32>
    %35 = arith.select %26, %33, %34 : vector<64x128xi1>, vector<64x128xf32>
    %cst_26 = arith.constant dense<0xFF800000> : vector<64xf32>
    %36 = vector.multi_reduction <maximumf>, %35, %cst_26 [1] : vector<64x128xf32> to vector<64xf32>
    %37 = vector.shape_cast %36 : vector<64xf32> to vector<64x1xf32>
    %38 = vector.broadcast %37 : vector<64x1xf32> to vector<64x128xf32>
    %39 = arith.subf %35, %38 : vector<64x128xf32>
    %40 = math.exp %39 : vector<64x128xf32>
    %cst_27 = arith.constant dense<0.000000e+00> : vector<64xf32>
    %41 = vector.multi_reduction <add>, %40, %cst_27 [1] : vector<64x128xf32> to vector<64xf32>
    %42 = vector.shape_cast %41 : vector<64xf32> to vector<64x1xf32>
    %43 = tpu.reciprocal %42 : vector<64x1xf32> -> vector<64x1xf32>
    %44 = vector.broadcast %43 : vector<64x1xf32> to vector<64x128xf32>
    %45 = arith.mulf %40, %44 : vector<64x128xf32>
    %cst_28 = arith.constant dense<0.000000e+00> : vector<128xf32>
    %46 = vector.multi_reduction <add>, %45, %cst_28 [0] : vector<64x128xf32> to vector<128xf32>
    %47 = vector.shape_cast %46 : vector<128xf32> to vector<1x128xf32>
    %cst_29 = arith.constant 1.000000e+00 : f32
    %48 = vector.broadcast %cst_29 : f32 to vector<1x128xf32>
    %49 = arith.select %29, %47, %48 : vector<1x128xi1>, vector<1x128xf32>
    %50 = tpu.reciprocal %49 : vector<1x128xf32> -> vector<1x128xf32>
    %51 = vector.broadcast %50 : vector<1x128xf32> to vector<64x128xf32>
    %52 = arith.mulf %45, %51 : vector<64x128xf32>
    %cst_30 = arith.constant dense<0.000000e+00> : vector<128x32xf32>
    %53 = tpu.matmul %52, %23, %cst_30 {dimension_numbers = #tpu.dot_dimension_numbers<[0], [0], [1], [1], [0, 1, 1, 1], [], []>} : vector<64x128xf32>, vector<64x32xf32>, vector<128x32xf32> -> vector<128x32xf32>
    %cst_31 = arith.constant dense<0.000000e+00> : vector<64x128xf32>
    %54 = tpu.matmul %23, %53, %cst_31 {dimension_numbers = #tpu.dot_dimension_numbers<[1], [1], [0], [0], [0, 0, 1, 0], [], []>} : vector<64x32xf32>, vector<128x32xf32>, vector<64x128xf32> -> vector<64x128xf32>
    %cst_32 = arith.constant 5.000000e+01 : f32
    %55 = vector.broadcast %cst_32 : f32 to vector<64x128xf32>
    %56 = arith.mulf %55, %54 : vector<64x128xf32>
    %cst_33 = arith.constant -1.000000e+30 : f32
    %57 = vector.broadcast %cst_33 : f32 to vector<64x128xf32>
    %58 = arith.select %26, %56, %57 : vector<64x128xi1>, vector<64x128xf32>
    %cst_34 = arith.constant dense<0xFF800000> : vector<64xf32>
    %59 = vector.multi_reduction <maximumf>, %58, %cst_34 [1] : vector<64x128xf32> to vector<64xf32>
    %60 = vector.shape_cast %59 : vector<64xf32> to vector<64x1xf32>
    %61 = vector.broadcast %60 : vector<64x1xf32> to vector<64x128xf32>
    %62 = arith.subf %58, %61 : vector<64x128xf32>
    %63 = math.exp %62 : vector<64x128xf32>
    %cst_35 = arith.constant dense<0.000000e+00> : vector<64xf32>
    %64 = vector.multi_reduction <add>, %63, %cst_35 [1] : vector<64x128xf32> to vector<64xf32>
    %65 = vector.shape_cast %64 : vector<64xf32> to vector<64x1xf32>
    %66 = tpu.reciprocal %65 : vector<64x1xf32> -> vector<64x1xf32>
    %67 = vector.broadcast %66 : vector<64x1xf32> to vector<64x128xf32>
    %68 = arith.mulf %63, %67 : vector<64x128xf32>
    %cst_36 = arith.constant dense<0.000000e+00> : vector<128xf32>
    %69 = vector.multi_reduction <add>, %68, %cst_36 [0] : vector<64x128xf32> to vector<128xf32>
    %70 = vector.shape_cast %69 : vector<128xf32> to vector<1x128xf32>
    %cst_37 = arith.constant 1.000000e+00 : f32
    %71 = vector.broadcast %cst_37 : f32 to vector<1x128xf32>
    %72 = arith.select %29, %70, %71 : vector<1x128xi1>, vector<1x128xf32>
    %73 = tpu.reciprocal %72 : vector<1x128xf32> -> vector<1x128xf32>
    %74 = vector.broadcast %73 : vector<1x128xf32> to vector<64x128xf32>
    %75 = arith.mulf %68, %74 : vector<64x128xf32>
    %cst_38 = arith.constant dense<0.000000e+00> : vector<128x32xf32>
    %76 = tpu.matmul %75, %23, %cst_38 {dimension_numbers = #tpu.dot_dimension_numbers<[0], [0], [1], [1], [0, 1, 1, 1], [], []>} : vector<64x128xf32>, vector<64x32xf32>, vector<128x32xf32> -> vector<128x32xf32>
    %cst_39 = arith.constant dense<0.000000e+00> : vector<64x128xf32>
    %77 = tpu.matmul %23, %76, %cst_39 {dimension_numbers = #tpu.dot_dimension_numbers<[1], [1], [0], [0], [0, 0, 1, 0], [], []>} : vector<64x32xf32>, vector<128x32xf32>, vector<64x128xf32> -> vector<64x128xf32>
    %cst_40 = arith.constant 5.000000e+01 : f32
    %78 = vector.broadcast %cst_40 : f32 to vector<64x128xf32>
    %79 = arith.mulf %78, %77 : vector<64x128xf32>
    %cst_41 = arith.constant -1.000000e+30 : f32
    %80 = vector.broadcast %cst_41 : f32 to vector<64x128xf32>
    %81 = arith.select %26, %79, %80 : vector<64x128xi1>, vector<64x128xf32>
    %cst_42 = arith.constant dense<0xFF800000> : vector<64xf32>
    %82 = vector.multi_reduction <maximumf>, %81, %cst_42 [1] : vector<64x128xf32> to vector<64xf32>
    %83 = vector.shape_cast %82 : vector<64xf32> to vector<64x1xf32>
    %84 = vector.broadcast %83 : vector<64x1xf32> to vector<64x128xf32>
    %85 = arith.subf %81, %84 : vector<64x128xf32>
    %86 = math.exp %85 : vector<64x128xf32>
    %cst_43 = arith.constant dense<0.000000e+00> : vector<64xf32>
    %87 = vector.multi_reduction <add>, %86, %cst_43 [1] : vector<64x128xf32> to vector<64xf32>
    %88 = vector.shape_cast %87 : vector<64xf32> to vector<64x1xf32>
    %89 = tpu.reciprocal %88 : vector<64x1xf32> -> vector<64x1xf32>
    %90 = vector.broadcast %89 : vector<64x1xf32> to vector<64x128xf32>
    %91 = arith.mulf %86, %90 : vector<64x128xf32>
    %c0_44 = arith.constant 0 : index
    %c0_45 = arith.constant 0 : index
    %92 = vector.load %arg7[%c0_44, %c0_45] : memref<128x32xf32, #tpu.memory_space<vmem>>, vector<128x32xf32>
    tpu.vector_store %arg7[%c0_44, %c0_45], %76 {strides = array<i32>} : memref<128x32xf32, #tpu.memory_space<vmem>>, vector<128x32xf32>,
    %c0_46 = arith.constant 0 : index
    %c0_47 = arith.constant 0 : index
    %93 = vector.load %arg8[%c0_46, %c0_47] : memref<64x128xf32, #tpu.memory_space<vmem>>, vector<64x128xf32>
    tpu.vector_store %arg8[%c0_46, %c0_47], %91 {strides = array<i32>} : memref<64x128xf32, #tpu.memory_space<vmem>>, vector<64x128xf32>,
    %c0_48 = arith.constant 0 : index
    %c0_49 = arith.constant 0 : index
    %94 = vector.load %arg10[%c0_48, %c0_49] : memref<64x128xf32, #tpu.memory_space<vmem>>, vector<64x128xf32>
    tpu.vector_store %arg10[%c0_48, %c0_49], %77 {strides = array<i32>} : memref<64x128xf32, #tpu.memory_space<vmem>>, vector<64x128xf32>,
    return
  }
}

</mosaic_0001>

<bundles_post_ra>
// kernel: tpu_custom_call.1
= control target key start
LH: loop header
LB: loop body
LE: loop exit
PB: predicated region body
PF: predicated region fallthrough
CT: control target
= control target key end

     0   :  { %16 = vsyncpa [#allocation3], 0  ;;  %vm42_vm0 = vcmask 130048   ;;  %s3082_s0 = inlined_call_operand.vmem [shape: f32[64,16], index: 0, kind: input, shape index: {}]   ;;  %s3083_s1 = inlined_call_operand.vmem [shape: f32[64,64], index: 1, kind: input, shape index: {}]   ;;  %s3084_s2 = inlined_call_operand.vmem [shape: f32[16,32], index: 2, kind: input, shape index: {}]   ;;  %s3085_s3 = inlined_call_operand.vmem [shape: f32[1,32], index: 3, kind: input, shape index: {}]   ;;  %s3086_s4 = inlined_call_operand.vmem [shape: f32[32,32], index: 4, kind: input, shape index: {}]   ;;  %s3087_s5 = inlined_call_operand.vmem [shape: f32[1,32], index: 5, kind: input, shape index: {}]   ;;  %s3088_s6 = inlined_call_operand.vmem [shape: f32[128,32], index: 6, kind: input, shape index: {}]   ;;  %s3089_s7 = inlined_call_operand.vmem [shape: f32[128,32], index: 7, kind: output, shape index: {0}]   ;;  %s3090_s8 = inlined_call_operand.hbm [shape: f32[64,128], index: 8, kind: output, shape index: {1}]   ;;  %s3091_s9 = inlined_call_operand.vmem [shape: f32[64,32], index: 9, kind: output, shape index: {2}]   ;;  %s3092_s10 = inlined_call_operand.hbm [shape: f32[64,128], index: 10, kind: output, shape index: {3}]  }
   0x1   :  { %v41_v0 = vld [vmem:[%s3084_s2 + $0x8] sm:$0xff]  ;;  %v40_v1 = vld [vmem:[%s3084_s2] sm:$0xff] }
   0x2   :  { %81 = vmatpush.msra.mxu0 %v41_v0  ;;  %v32_v2 = vld [vmem:[%s3082_s0] sm:$0xff] }
   0x4   :  { %82 = vmatpush.msra.mxu0 %v40_v1 }
   0x5   :  { %17 = vsyncpa [#allocation5], 0  ;;  %1761 = vmatmul.msk.f32.vlgmr.msra.gmra.mxu0 %vm42_vm0, %v32_v2  ;;  %v33_v3 = vld [vmem:[%s3082_s0 + $0x8] sm:$0xff]  ;;  %v34_v4 = vld [vmem:[%s3082_s0 + $0x10] sm:$0xff]  ;;  %vm120_vm1 = vcmask 523264   ;;  %vm198_vm2 = vcmask 261120  }
   0x6   :  { %v35_v5 = vld [vmem:[%s3082_s0 + $0x18] sm:$0xff]  ;;  %v36_v6 = vld [vmem:[%s3082_s0 + $0x20] sm:$0xff]  ;;  %v37_v7 = vld [vmem:[%s3082_s0 + $0x28] sm:$0xff]  ;;  %s1740_s15 = sshll.u32 %s3092_s10, 4  ;;  %s2082_s16 = smov 8   ;;  %s1741_s15 = int_to_ptr.hbm [resolvable:$true] %s1740_s15 }
   0x7   :  { %v38_v8 = vld [vmem:[%s3082_s0 + $0x30] sm:$0xff]  ;;  %v39_v9 = vld [vmem:[%s3082_s0 + $0x38] sm:$0xff]  ;;  %v2180_v18 = vld [vmem:[%s3083_s1] sm:$0xff]  ;;  %s2083_s10 = smov [#allocation2]   ;;  %s1725_s20 = sshll.u32 %s3090_s8, 4  ;;  %s1726_s20 = int_to_ptr.hbm [resolvable:$true] %s1725_s20 }
   0x8   :  { %v2187_v19 = vld [vmem:[%s3083_s1 + $0x8] sm:$0xff]  ;;  %v2194_v20 = vld [vmem:[%s3083_s1 + $0x10] sm:$0xff]  ;;  %v2201_v21 = vld [vmem:[%s3083_s1 + $0x18] sm:$0xff]  ;;  %s1723_s17 = sshll.u32 %s2083_s10, 4  ;;  %s1724_s17 = int_to_ptr.vmem [resolvable:$true] %s1723_s17 }
   0x9   :  { %v197_v22 = vld [vmem:[%s3086_s4 + $0x18] sm:$0xff]  ;;  %v2211_v23 = vld [vmem:[%s3083_s1 + $0x20] sm:$0xff]  ;;  %v2218_v24 = vld [vmem:[%s3083_s1 + $0x28] sm:$0xff] }
   0xa   :  { %235 = vmatpush.msra.mxu2 %v197_v22  ;;  %v2225_v25 = vld [vmem:[%s3083_s1 + $0x30] sm:$0xff]  ;;  %v2232_v26 = vld [vmem:[%s3083_s1 + $0x38] sm:$0xff]  ;;  %v195_v28 = vld [vmem:[%s3086_s4 + $0x8] sm:$0xff] }
   0xb   :  { %v196_v27 = vld [vmem:[%s3086_s4 + $0x10] sm:$0xff]  ;;  %v194_v29 = vld [vmem:[%s3086_s4] sm:$0xff] }
   0xc   :  { %236 = vmatpush.msra.mxu2 %v196_v27  ;;  %v1910_v30 = vld [vmem:[%s3085_s3] ss:$0 sm:$0xff]  ;;  %v451_v27 = vld [vmem:[%s3088_s6 + $0x58] sm:$0xff] }
   0xd   :  { %1762 = vmatmul.msk.f32.gmra.mxu0 %vm42_vm0, %v33_v3  ;;  %v1911_v63 = vld [vmem:[%s3087_s5] ss:$0 sm:$0xff]  ;;  %s2081_s5 = smov 128  }
   0xe   :  { %237 = vmatpush.msra.mxu2 %v195_v28 }
  0x10   :  { %238 = vmatpush.msra.mxu2 %v194_v29 }
  0x15   :  { %1763 = vmatmul.msk.f32.gmra.mxu0 %vm42_vm0, %v34_v4 }
  0x1d   :  { %1764 = vmatmul.msk.f32.gmra.mxu0 %vm42_vm0, %v35_v5 }
  0x25   :  { %1765 = vmatmul.msk.f32.gmra.mxu0 %vm42_vm0, %v36_v6 }
  0x2d   :  { %1766 = vmatmul.msk.f32.gmra.mxu0 %vm42_vm0, %v37_v7 }
  0x35   :  { %1767 = vmatmul.msk.f32.gmra.mxu0 %vm42_vm0, %v38_v8 }
  0x3d   :  { %1768 = vmatmul.msk.f32.gmra.mxu0 %vm42_vm0, %v39_v9 }
  0x82   :  { %v84_v10 = vpop.f32.mrf.mxu0 }
  0x8a   :  { %v87_v11 = vpop.f32.mrf.mxu0 }
  0x92   :  { %v90_v12 = vpop.f32.mrf.mxu0 }
  0x9a   :  { %v93_v13 = vpop.f32.mrf.mxu0 }
  0xa2   :  { %v96_v14 = vpop.f32.mrf.mxu0 }
  0xaa   :  { %v99_v15 = vpop.f32.mrf.mxu0 }
  0xb2   :  { %v102_v16 = vpop.f32.mrf.mxu0 }
  0xba   :  { %v105_v17 = vpop.f32.mrf.mxu0 }
  0xbb   :  { %153 = vmatpush.msra.mxu1 %v105_v17 }
  0xbd   :  { %154 = vmatpush.msra.mxu1 %v102_v16  ;;  %v455_v16 = vld [vmem:[%s3088_s6 + $0x78] sm:$0xff] }
  0xbe   :  { %1793 = vmatpush.xpose.msk.msrb.mxu0 %vm198_vm2, %v455_v16 }
  0xbf   :  { %155 = vmatpush.msra.mxu1 %v99_v15 }
  0xc1   :  { %156 = vmatpush.msra.mxu1 %v96_v14 }
  0xc3   :  { %157 = vmatpush.msra.mxu1 %v93_v13 }
  0xc5   :  { %158 = vmatpush.msra.mxu1 %v90_v12 }
  0xc7   :  { %159 = vmatpush.msra.mxu1 %v87_v11 }
  0xc9   :  { %160 = vmatpush.msra.mxu1 %v84_v10 }
  0xca   :  { %1769 = vmatmul.msk.f32.vlgmr.msra.gmra.mxu1 %vm120_vm1, %v2180_v18 }
  0xd2   :  { %1770 = vmatmul.msk.f32.gmra.mxu1 %vm120_vm1, %v2187_v19 }
  0xda   :  { %1771 = vmatmul.msk.f32.gmra.mxu1 %vm120_vm1, %v2194_v20 }
  0xe2   :  { %1772 = vmatmul.msk.f32.gmra.mxu1 %vm120_vm1, %v2201_v21 }
  0xea   :  { %1773 = vmatmul.msk.f32.gmra.mxu1 %vm120_vm1, %v2211_v23 }
  0xf2   :  { %1774 = vmatmul.msk.f32.gmra.mxu1 %vm120_vm1, %v2218_v24 }
  0xfa   :  { %1775 = vmatmul.msk.f32.gmra.mxu1 %vm120_vm1, %v2225_v25 }
 0x102   :  { %1776 = vmatmul.msk.f32.gmra.mxu1 %vm120_vm1, %v2232_v26 }
 0x147   :  { %v162_v31 = vpop.f32.mrf.mxu1 }
 0x148   :  { %v163_v32 = vadd.f32 %v1910_v30, %v162_v31 }
 0x14a   :  { %v186_v33 = vmax.f32 %v163_v32, 0.0 }
 0x14c   :  { %1777 = vmatmul.msk.f32.vlgmr.msra.gmra.mxu2 %vm198_vm2, %v186_v33  ;;  %v449_v33 = vld [vmem:[%s3088_s6 + $0x48] sm:$0xff] }
 0x14f   :  { %v165_v34 = vpop.f32.mrf.mxu1 }
 0x150   :  { %v166_v35 = vadd.f32 %v1910_v30, %v165_v34 }
 0x152   :  { %v187_v36 = vmax.f32 %v166_v35, 0.0 }
 0x154   :  { %1778 = vmatmul.msk.f32.gmra.mxu2 %vm198_vm2, %v187_v36  ;;  %v448_v36 = vld [vmem:[%s3088_s6 + $0x40] sm:$0xff] }
 0x157   :  { %v168_v37 = vpop.f32.mrf.mxu1 }
 0x158   :  { %v169_v38 = vadd.f32 %v1910_v30, %v168_v37 }
 0x15a   :  { %v188_v39 = vmax.f32 %v169_v38, 0.0 }
 0x15c   :  { %1779 = vmatmul.msk.f32.gmra.mxu2 %vm198_vm2, %v188_v39  ;;  %v447_v39 = vld [vmem:[%s3088_s6 + $0x38] sm:$0xff] }
 0x15f   :  { %v171_v40 = vpop.f32.mrf.mxu1 }
 0x160   :  { %v172_v41 = vadd.f32 %v1910_v30, %v171_v40 }
 0x162   :  { %v189_v42 = vmax.f32 %v172_v41, 0.0  ;;  %v446_v41 = vld [vmem:[%s3088_s6 + $0x30] sm:$0xff] }
 0x164   :  { %1780 = vmatmul.msk.f32.gmra.mxu2 %vm198_vm2, %v189_v42  ;;  %v445_v42 = vld [vmem:[%s3088_s6 + $0x28] sm:$0xff] }
 0x167   :  { %v174_v43 = vpop.f32.mrf.mxu1 }
 0x168   :  { %v175_v44 = vadd.f32 %v1910_v30, %v174_v43  ;;  %v444_v43 = vld [vmem:[%s3088_s6 + $0x20] sm:$0xff] }
 0x16a   :  { %v190_v45 = vmax.f32 %v175_v44, 0.0  ;;  %v443_v44 = vld [vmem:[%s3088_s6 + $0x18] sm:$0xff] }
 0x16c   :  { %1781 = vmatmul.msk.f32.gmra.mxu2 %vm198_vm2, %v190_v45  ;;  %v442_v45 = vld [vmem:[%s3088_s6 + $0x10] sm:$0xff] }
 0x16f   :  { %v177_v46 = vpop.f32.mrf.mxu1 }
 0x170   :  { %v178_v47 = vadd.f32 %v1910_v30, %v177_v46  ;;  %v441_v46 = vld [vmem:[%s3088_s6 + $0x8] sm:$0xff] }
 0x172   :  { %v191_v48 = vmax.f32 %v178_v47, 0.0  ;;  %v440_v47 = vld [vmem:[%s3088_s6] sm:$0xff] }
 0x174   :  { %1782 = vmatmul.msk.f32.gmra.mxu2 %vm198_vm2, %v191_v48 }
 0x177   :  { %v180_v49 = vpop.f32.mrf.mxu1 }
 0x178   :  { %v181_v50 = vadd.f32 %v1910_v30, %v180_v49 }
 0x17a   :  { %v192_v51 = vmax.f32 %v181_v50, 0.0 }
 0x17c   :  { %1783 = vmatmul.msk.f32.gmra.mxu2 %vm198_vm2, %v192_v51 }
 0x17f   :  { %v183_v52 = vpop.f32.mrf.mxu1 }
 0x180   :  { %v184_v53 = vadd.f32 %v1910_v30, %v183_v52  ;;  %v450_v30 = vld [vmem:[%s3088_s6 + $0x50] sm:$0xff] }
 0x182   :  { %v193_v54 = vmax.f32 %v184_v53, 0.0 }
 0x184   :  { %1784 = vmatmul.msk.f32.gmra.mxu2 %vm198_vm2, %v193_v54 }
 0x1cf   :  { %v240_v55 = vpop.f32.mrf.mxu2 }
 0x1d7   :  { %v243_v56 = vpop.f32.mrf.mxu2 }
 0x1df   :  { %v246_v57 = vpop.f32.mrf.mxu2 }
 0x1e7   :  { %v249_v58 = vpop.f32.mrf.mxu2 }
 0x1ef   :  { %v252_v59 = vpop.f32.mrf.mxu2 }
 0x1f7   :  { %v255_v60 = vpop.f32.mrf.mxu2 }
 0x1ff   :  { %v258_v61 = vpop.f32.mrf.mxu2 }
 0x207   :  { %v261_v62 = vpop.f32.mrf.mxu2 }
 0x208   :  { %276 = vmatpush.msra.mxu3 %v261_v62 }
 0x20a   :  { %277 = vmatpush.msra.mxu3 %v258_v61 }
 0x20c   :  { %278 = vmatpush.msra.mxu3 %v255_v60 }
 0x20e   :  { %279 = vmatpush.msra.mxu3 %v252_v59 }
 0x210   :  { %280 = vmatpush.msra.mxu3 %v249_v58 }
 0x212   :  { %281 = vmatpush.msra.mxu3 %v246_v57 }
 0x214   :  { %282 = vmatpush.msra.mxu3 %v243_v56 }
 0x216   :  { %283 = vmatpush.msra.mxu3 %v240_v55 }
 0x217   :  { %1785 = vmatmul.msk.f32.vlgmr.msra.gmra.mxu3 %vm120_vm1, %v2180_v18  ;;  %v454_v18 = vld [vmem:[%s3088_s6 + $0x70] sm:$0xff] }
 0x218   :  { %1794 = vmatpush.xpose.msk.msrb.mxu0 %vm198_vm2, %v454_v18 }
 0x21f   :  { %1786 = vmatmul.msk.f32.gmra.mxu3 %vm120_vm1, %v2187_v19 }
 0x227   :  { %1787 = vmatmul.msk.f32.gmra.mxu3 %vm120_vm1, %v2194_v20 }
 0x22f   :  { %1788 = vmatmul.msk.f32.gmra.mxu3 %vm120_vm1, %v2201_v21  ;;  %v453_v21 = vld [vmem:[%s3088_s6 + $0x68] sm:$0xff] }
 0x230   :  { %1795 = vmatpush.xpose.msk.msrb.mxu0 %vm198_vm2, %v453_v21 }
 0x237   :  { %1789 = vmatmul.msk.f32.gmra.mxu3 %vm120_vm1, %v2211_v23 }
 0x23f   :  { %1790 = vmatmul.msk.f32.gmra.mxu3 %vm120_vm1, %v2218_v24  ;;  %v452_v24 = vld [vmem:[%s3088_s6 + $0x60] sm:$0xff] }
 0x240   :  { %1796 = vmatpush.xpose.msk.msrb.mxu0 %vm198_vm2, %v452_v24 }
 0x244   :  { %1797 = vmatpush.xpose.msk.msrb.mxu0 %vm198_vm2, %v451_v27 }
 0x247   :  { %1791 = vmatmul.msk.f32.gmra.mxu3 %vm120_vm1, %v2225_v25 }
 0x248   :  { %1798 = vmatpush.xpose.msk.msrb.mxu0 %vm198_vm2, %v450_v30 }
 0x24c   :  { %1799 = vmatpush.xpose.msk.msrb.mxu0 %vm198_vm2, %v449_v33 }
 0x24f   :  { %1792 = vmatmul.msk.f32.gmra.mxu3 %vm120_vm1, %v2232_v26 }
 0x250   :  { %1800 = vmatpush.xpose.msk.msrb.mxu0 %vm198_vm2, %v448_v36 }
 0x254   :  { %1801 = vmatpush.xpose.msk.msrb.mxu0 %vm198_vm2, %v447_v39 }
 0x258   :  { %1802 = vmatpush.xpose.msk.msrb.mxu0 %vm198_vm2, %v446_v41 }
 0x25c   :  { %1803 = vmatpush.xpose.msk.msrb.mxu0 %vm198_vm2, %v445_v42 }
 0x260   :  { %1804 = vmatpush.xpose.msk.msrb.mxu0 %vm198_vm2, %v444_v43 }
 0x264   :  { %1805 = vmatpush.xpose.msk.msrb.mxu0 %vm198_vm2, %v443_v44 }
 0x268   :  { %1806 = vmatpush.xpose.msk.msrb.mxu0 %vm198_vm2, %v442_v45 }
 0x26c   :  { %1807 = vmatpush.xpose.msk.msrb.mxu0 %vm198_vm2, %v441_v46 }
 0x270   :  { %1808 = vmatpush.xpose.msk.msrb.mxu0 %vm198_vm2, %v440_v47 }
 0x29a   :  { %v285_v0 = vpop.f32.mrf.mxu3 }
 0x29b   :  { %v2275_v1 = vadd.f32 %v1911_v63, %v285_v0 }
 0x29d   :  { %309 = vst.msk [vmem:[%s3091_s9] sm:$0xff] %vm198_vm2, %v2275_v1  ;;  %v317_v2 = vmul.f32 %v2275_v1, %v2275_v1 }
 0x29f   :  { %v325_v3 = vsel %vm198_vm2, %v317_v2, 0.0 }
 0x2a0   :  { %326 = vadd.xlane.f32.xlu0 %v325_v3 }
 0x2a2   :  { %v288_v4 = vpop.f32.mrf.mxu3 }
 0x2a3   :  { %v2285_v5 = vadd.f32 %v1911_v63, %v288_v4 }
 0x2a5   :  { %310 = vst.msk [vmem:[%s3091_s9 + $0x8] sm:$0xff] %vm198_vm2, %v2285_v5  ;;  %v318_v6 = vmul.f32 %v2285_v5, %v2285_v5 }
 0x2a7   :  { %v328_v7 = vsel %vm198_vm2, %v318_v6, 0.0 }
 0x2a8   :  { %329 = vadd.xlane.f32.xlu0 %v328_v7 }
 0x2aa   :  { %v291_v8 = vpop.f32.mrf.mxu3 }
 0x2ab   :  { %v2295_v9 = vadd.f32 %v1911_v63, %v291_v8 }
 0x2ad   :  { %311 = vst.msk [vmem:[%s3091_s9 + $0x10] sm:$0xff] %vm198_vm2, %v2295_v9  ;;  %v319_v10 = vmul.f32 %v2295_v9, %v2295_v9 }
 0x2af   :  { %v331_v11 = vsel %vm198_vm2, %v319_v10, 0.0 }
 0x2b0   :  { %332 = vadd.xlane.f32.xlu1 %v331_v11 }
 0x2b2   :  { %v294_v12 = vpop.f32.mrf.mxu3 }
 0x2b3   :  { %v2305_v13 = vadd.f32 %v1911_v63, %v294_v12 }
 0x2b5   :  { %312 = vst.msk [vmem:[%s3091_s9 + $0x18] sm:$0xff] %vm198_vm2, %v2305_v13  ;;  %v320_v14 = vmul.f32 %v2305_v13, %v2305_v13 }
 0x2b7   :  { %v334_v15 = vsel %vm198_vm2, %v320_v14, 0.0 }
 0x2b8   :  { %335 = vadd.xlane.f32.xlu1 %v334_v15 }
 0x2ba   :  { %v297_v17 = vpop.f32.mrf.mxu3 }
 0x2bb   :  { %v2322_v19 = vadd.f32 %v1911_v63, %v297_v17 }
 0x2bd   :  { %313 = vst.msk [vmem:[%s3091_s9 + $0x20] sm:$0xff] %vm198_vm2, %v2322_v19  ;;  %v321_v20 = vmul.f32 %v2322_v19, %v2322_v19 }
 0x2bf   :  { %v337_v22 = vsel %vm198_vm2, %v321_v20, 0.0 }
 0x2c0   :  { %338 = vadd.xlane.f32.xlu2 %v337_v22 }
 0x2c2   :  { %v300_v23 = vpop.f32.mrf.mxu3 }
 0x2c3   :  { %v2340_v25 = vadd.f32 %v1911_v63, %v300_v23 }
 0x2c5   :  { %314 = vst.msk [vmem:[%s3091_s9 + $0x28] sm:$0xff] %vm198_vm2, %v2340_v25  ;;  %v322_v26 = vmul.f32 %v2340_v25, %v2340_v25 }
 0x2c7   :  { %v340_v28 = vsel %vm198_vm2, %v322_v26, 0.0 }
 0x2c8   :  { %341 = vadd.xlane.f32.xlu2 %v340_v28 }
 0x2ca   :  { %v303_v29 = vpop.f32.mrf.mxu3 }
 0x2cb   :  { %v2358_v31 = vadd.f32 %v1911_v63, %v303_v29 }
 0x2cd   :  { %315 = vst.msk [vmem:[%s3091_s9 + $0x30] sm:$0xff] %vm198_vm2, %v2358_v31  ;;  %v323_v32 = vmul.f32 %v2358_v31, %v2358_v31 }
 0x2cf   :  { %v343_v34 = vsel %vm198_vm2, %v323_v32, 0.0 }
 0x2d0   :  { %344 = vadd.xlane.f32.xlu0 %v343_v34 }
 0x2d2   :  { %v306_v35 = vpop.f32.mrf.mxu3 }
 0x2d3   :  { %v2376_v37 = vadd.f32 %v1911_v63, %v306_v35 }
 0x2d5   :  { %316 = vst.msk [vmem:[%s3091_s9 + $0x38] sm:$0xff] %vm198_vm2, %v2376_v37  ;;  %v324_v38 = vmul.f32 %v2376_v37, %v2376_v37 }
 0x2d7   :  { %v346_v40 = vsel %vm198_vm2, %v324_v38, 0.0 }
 0x2d8   :  { %347 = vadd.xlane.f32.xlu1 %v346_v40 }
 0x313   :  { %v327_v48 = vpop.xlane.xlu0 %326 }
 0x314   :  { %1912 = vrsqrt.f32 %v327_v48  ;;  %vm355_vm4 = vweird.f32 %v327_v48 }
 0x31a   :  { %v1913_v49 = vpop.eup %1912 }
 0x31b   :  { %v350_v50 = vmul.f32 %v1913_v49, %v327_v48  ;;  %v330_v51 = vpop.xlane.xlu0 %329  ;;  %vm356_vm3 = vweird.f32 %v1913_v49 }
 0x31c   :  { %1914 = vrsqrt.f32 %v330_v51  ;;  %vm357_vm5 = vmor %vm355_vm4, %vm356_vm3  ;;  %vm365_vm7 = vweird.f32 %v330_v51 }
 0x31d   :  { %v351_v52 = vmul.f32 %v1913_v49, %v350_v50 }
 0x31f   :  { %v352_v53 = vmul.f32 0.5, %v351_v52 }
 0x321   :  { %v353_v54 = vsub.f32 1.5, %v352_v53 }
 0x322   :  { %v1915_v55 = vpop.eup %1914 }
 0x323   :  { %v354_v56 = vmul.f32 %v1913_v49, %v353_v54  ;;  %v360_v57 = vmul.f32 %v1915_v55, %v330_v51  ;;  %v333_v58 = vpop.xlane.xlu1 %332  ;;  %vm366_vm6 = vweird.f32 %v1915_v55 }
 0x324   :  { %1916 = vrsqrt.f32 %v333_v58  ;;  %vm367_vm8 = vmor %vm365_vm7, %vm366_vm6  ;;  %vm375_vm10 = vweird.f32 %v333_v58 }
 0x325   :  { %v358_v59 = vsel %vm357_vm5, %v1913_v49, %v354_v56  ;;  %v361_v60 = vmul.f32 %v1915_v55, %v360_v57 }
 0x326   :  { %v2420_v61 = vmul.f32 %v358_v59, %v2275_v1 }
 0x327   :  { %v362_v62 = vmul.f32 0.5, %v361_v60 }
 0x328   :  { %1809 = vmatmul.msk.f32.vlgmr.msrb.gmra.mxu0 %vm198_vm2, %v2420_v61 }
 0x329   :  { %v363_v63 = vsub.f32 1.5, %v362_v62 }
 0x32a   :  { %v1917_v0 = vpop.eup %1916 }
 0x32b   :  { %v364_v2 = vmul.f32 %v1915_v55, %v363_v63  ;;  %v370_v3 = vmul.f32 %v1917_v0, %v333_v58  ;;  %v336_v4 = vpop.xlane.xlu1 %335  ;;  %vm376_vm9 = vweird.f32 %v1917_v0 }
 0x32c   :  { %1918 = vrsqrt.f32 %v336_v4  ;;  %vm377_vm11 = vmor %vm375_vm10, %vm376_vm9  ;;  %vm385_vm13 = vweird.f32 %v336_v4 }
 0x32d   :  { %v368_v6 = vsel %vm367_vm8, %v1915_v55, %v364_v2  ;;  %v371_v7 = vmul.f32 %v1917_v0, %v370_v3 }
 0x32e   :  { %v2425_v8 = vmul.f32 %v368_v6, %v2285_v5 }
 0x32f   :  { %v372_v1 = vmul.f32 0.5, %v371_v7 }
 0x330   :  { %1810 = vmatmul.msk.f32.gmra.mxu0 %vm198_vm2, %v2425_v8 }
 0x331   :  { %v373_v10 = vsub.f32 1.5, %v372_v1 }
 0x332   :  { %v1919_v11 = vpop.eup %1918 }
 0x333   :  { %v374_v12 = vmul.f32 %v1917_v0, %v373_v10  ;;  %v380_v14 = vmul.f32 %v1919_v11, %v336_v4  ;;  %v339_v15 = vpop.xlane.xlu2 %338  ;;  %vm386_vm12 = vweird.f32 %v1919_v11 }
 0x334   :  { %1920 = vrsqrt.f32 %v339_v15  ;;  %vm387_vm14 = vmor %vm385_vm13, %vm386_vm12  ;;  %vm395_vm0 = vweird.f32 %v339_v15 }
 0x335   :  { %v378_v16 = vsel %vm377_vm11, %v1917_v0, %v374_v12  ;;  %v381_v17 = vmul.f32 %v1919_v11, %v380_v14 }
 0x336   :  { %v2430_v18 = vmul.f32 %v378_v16, %v2295_v9 }
 0x337   :  { %v382_v5 = vmul.f32 0.5, %v381_v17 }
 0x338   :  { %1811 = vmatmul.msk.f32.gmra.mxu0 %vm198_vm2, %v2430_v18 }
 0x339   :  { %v383_v20 = vsub.f32 1.5, %v382_v5 }
 0x33a   :  { %v1921_v21 = vpop.eup %1920 }
 0x33b   :  { %v384_v22 = vmul.f32 %v1919_v11, %v383_v20  ;;  %v390_v23 = vmul.f32 %v1921_v21, %v339_v15  ;;  %v342_v24 = vpop.xlane.xlu2 %341  ;;  %vm396_vm15 = vweird.f32 %v1921_v21 }
 0x33c   :  { %1922 = vrsqrt.f32 %v342_v24  ;;  %vm397_vm3 = vmor %vm395_vm0, %vm396_vm15  ;;  %vm405_vm5 = vweird.f32 %v342_v24 }
 0x33d   :  { %v388_v26 = vsel %vm387_vm14, %v1919_v11, %v384_v22  ;;  %v391_v27 = vmul.f32 %v1921_v21, %v390_v23 }
 0x33e   :  { %v2435_v28 = vmul.f32 %v388_v26, %v2305_v13 }
 0x33f   :  { %v392_v9 = vmul.f32 0.5, %v391_v27 }
 0x340   :  { %1812 = vmatmul.msk.f32.gmra.mxu0 %vm198_vm2, %v2435_v28 }
 0x341   :  { %v393_v29 = vsub.f32 1.5, %v392_v9 }
 0x342   :  { %v1923_v30 = vpop.eup %1922 }
 0x343   :  { %v394_v32 = vmul.f32 %v1921_v21, %v393_v29  ;;  %v400_v33 = vmul.f32 %v1923_v30, %v342_v24  ;;  %v345_v34 = vpop.xlane.xlu0 %344  ;;  %vm406_vm4 = vweird.f32 %v1923_v30 }
 0x344   :  { %1924 = vrsqrt.f32 %v345_v34  ;;  %vm407_vm6 = vmor %vm405_vm5, %vm406_vm4  ;;  %vm415_vm8 = vweird.f32 %v345_v34 }
 0x345   :  { %v398_v35 = vsel %vm397_vm3, %v1921_v21, %v394_v32  ;;  %v401_v36 = vmul.f32 %v1923_v30, %v400_v33 }
 0x346   :  { %v2440_v38 = vmul.f32 %v398_v35, %v2322_v19 }
 0x347   :  { %v402_v13 = vmul.f32 0.5, %v401_v36 }
 0x348   :  { %1813 = vmatmul.msk.f32.gmra.mxu0 %vm198_vm2, %v2440_v38 }
 0x349   :  { %v403_v39 = vsub.f32 1.5, %v402_v13 }
 0x34a   :  { %v1925_v40 = vpop.eup %1924 }
 0x34b   :  { %v404_v41 = vmul.f32 %v1923_v30, %v403_v39  ;;  %v410_v42 = vmul.f32 %v1925_v40, %v345_v34  ;;  %v348_v43 = vpop.xlane.xlu1 %347  ;;  %vm416_vm7 = vweird.f32 %v1925_v40 }
 0x34c   :  { %1926 = vrsqrt.f32 %v348_v43  ;;  %vm417_vm9 = vmor %vm415_vm8, %vm416_vm7  ;;  %vm425_vm11 = vweird.f32 %v348_v43 }
 0x34d   :  { %v408_v44 = vsel %vm407_vm6, %v1923_v30, %v404_v41  ;;  %v411_v45 = vmul.f32 %v1925_v40, %v410_v42 }
 0x34e   :  { %v2445_v46 = vmul.f32 %v408_v44, %v2340_v25 }
 0x34f   :  { %v412_v19 = vmul.f32 0.5, %v411_v45 }
 0x350   :  { %1814 = vmatmul.msk.f32.gmra.mxu0 %vm198_vm2, %v2445_v46 }
 0x351   :  { %v413_v47 = vsub.f32 1.5, %v412_v19 }
 0x352   :  { %v1927_v48 = vpop.eup %1926 }
 0x353   :  { %v414_v49 = vmul.f32 %v1925_v40, %v413_v47  ;;  %v420_v50 = vmul.f32 %v1927_v48, %v348_v43  ;;  %vm426_vm10 = vweird.f32 %v1927_v48 }
 0x354   :  { %vm427_vm12 = vmor %vm425_vm11, %vm426_vm10 }
 0x355   :  { %v418_v51 = vsel %vm417_vm9, %v1925_v40, %v414_v49  ;;  %v421_v52 = vmul.f32 %v1927_v48, %v420_v50 }
 0x356   :  { %v2450_v53 = vmul.f32 %v418_v51, %v2358_v31  ;;  %v437_v31 = vlaneseq }
 0x357   :  { %v422_v54 = vmul.f32 0.5, %v421_v52 }
 0x358   :  { %1815 = vmatmul.msk.f32.gmra.mxu0 %vm198_vm2, %v2450_v53 }
 0x359   :  { %v423_v25 = vsub.f32 1.5, %v422_v54 }
 0x35b   :  { %v424_v55 = vmul.f32 %v1927_v48, %v423_v25 }
 0x35d   :  { %v428_v56 = vsel %vm427_vm12, %v1927_v48, %v424_v55 }
 0x35e   :  { %v2455_v57 = vmul.f32 %v428_v56, %v2376_v37  ;;  %v2475_v37 = vand.u32 127, %v437_v31 }
 0x360   :  { %1816 = vmatmul.msk.f32.gmra.mxu0 %vm198_vm2, %v2455_v57  ;;  %885 = vmatpush.msrb.mxu2 %v2455_v57  ;;  %vm439_vm13 = vcmp.lt.s32.totalorder %v2475_v37, 5 }
 0x361   :  { %1897 = vmatpush.msrb.mxu3 %v2455_v57 }
 0x362   :  { %886 = vmatpush.msrb.mxu2 %v2450_v53 }
 0x363   :  { %1898 = vmatpush.msrb.mxu3 %v2450_v53 }
 0x364   :  { %887 = vmatpush.msrb.mxu2 %v2445_v46 }
 0x365   :  { %1899 = vmatpush.msrb.mxu3 %v2445_v46 }
 0x366   :  { %888 = vmatpush.msrb.mxu2 %v2440_v38 }
 0x367   :  { %1900 = vmatpush.msrb.mxu3 %v2440_v38 }
 0x368   :  { %889 = vmatpush.msrb.mxu2 %v2435_v28 }
 0x369   :  { %1901 = vmatpush.msrb.mxu3 %v2435_v28 }
 0x36a   :  { %890 = vmatpush.msrb.mxu2 %v2430_v18 }
 0x36b   :  { %1902 = vmatpush.msrb.mxu3 %v2430_v18 }
 0x36c   :  { %891 = vmatpush.msrb.mxu2 %v2425_v8 }
 0x36d   :  { %1903 = vmatpush.msrb.mxu3 %v2425_v8 }
 0x36e   :  { %892 = vmatpush.msrb.mxu2 %v2420_v61 }
 0x36f   :  { %1904 = vmatpush.msrb.mxu3 %v2420_v61 }
 0x3a5   :  { %v545_v58 = vpop.f32.mrf.mxu0 }
 0x3a6   :  { %v569_v59 = vmul.f32 50.0, %v545_v58 }
 0x3a8   :  { %v577_v60 = vsel %vm439_vm13, %v569_v59, -1e+30 }
 0x3a9   :  { %585 = vmax.xlane.f32.xlu2 %v577_v60 }
 0x3ad   :  { %v548_v62 = vpop.f32.mrf.mxu0 }
 0x3ae   :  { %v570_v63 = vmul.f32 50.0, %v548_v62 }
 0x3b0   :  { %v578_v0 = vsel %vm439_vm13, %v570_v63, -1e+30 }
 0x3b1   :  { %587 = vmax.xlane.f32.xlu0 %v578_v0 }
 0x3b5   :  { %v551_v2 = vpop.f32.mrf.mxu0 }
 0x3b6   :  { %v571_v3 = vmul.f32 50.0, %v551_v2 }
 0x3b8   :  { %v579_v4 = vsel %vm439_vm13, %v571_v3, -1e+30 }
 0x3b9   :  { %589 = vmax.xlane.f32.xlu1 %v579_v4 }
 0x3bd   :  { %v554_v6 = vpop.f32.mrf.mxu0 }
 0x3be   :  { %v572_v7 = vmul.f32 50.0, %v554_v6 }
 0x3c0   :  { %v580_v1 = vsel %vm439_vm13, %v572_v7, -1e+30 }
 0x3c1   :  { %591 = vmax.xlane.f32.xlu2 %v580_v1 }
 0x3c5   :  { %v557_v10 = vpop.f32.mrf.mxu0 }
 0x3c6   :  { %v573_v11 = vmul.f32 50.0, %v557_v10 }
 0x3c8   :  { %v581_v12 = vsel %vm439_vm13, %v573_v11, -1e+30 }
 0x3c9   :  { %593 = vmax.xlane.f32.xlu0 %v581_v12 }
 0x3cd   :  { %v560_v14 = vpop.f32.mrf.mxu0 }
 0x3ce   :  { %v574_v15 = vmul.f32 50.0, %v560_v14 }
 0x3d0   :  { %v582_v16 = vsel %vm439_vm13, %v574_v15, -1e+30 }
 0x3d1   :  { %595 = vmax.xlane.f32.xlu1 %v582_v16 }
 0x3d5   :  { %v563_v17 = vpop.f32.mrf.mxu0 }
 0x3d6   :  { %v575_v5 = vmul.f32 50.0, %v563_v17 }
 0x3d8   :  { %v583_v20 = vsel %vm439_vm13, %v575_v5, -1e+30 }
 0x3d9   :  { %597 = vmax.xlane.f32.xlu2 %v583_v20 }
 0x3dd   :  { %v566_v21 = vpop.f32.mrf.mxu0 }
 0x3de   :  { %v576_v22 = vmul.f32 50.0, %v566_v21 }
 0x3e0   :  { %v584_v23 = vsel %vm439_vm13, %v576_v22, -1e+30 }
 0x3e1   :  { %599 = vmax.xlane.f32.xlu0 %v584_v23 }
 0x41c   :  { %v586_v24 = vpop.xlane.xlu2 %585 }
 0x41d   :  { %v601_v26 = vsub.f32 %v577_v60, %v586_v24 }
 0x41f   :  { %v609_v27 = vmul.f32 1.442695, %v601_v26 }
 0x421   :  { %1928 = vpow2.f32 %v609_v27 }
 0x424   :  { %v588_v9 = vpop.xlane.xlu0 %587 }
 0x425   :  { %v602_v29 = vsub.f32 %v578_v0, %v588_v9 }
 0x427   :  { %v2494_v30 = vpop.eup %1928  ;;  %v611_v32 = vmul.f32 1.442695, %v602_v29 }
 0x428   :  { %625 = vadd.xlane.f32.xlu1 %v2494_v30 }
 0x429   :  { %1930 = vpow2.f32 %v611_v32 }
 0x42c   :  { %v590_v33 = vpop.xlane.xlu1 %589 }
 0x42d   :  { %v603_v34 = vsub.f32 %v579_v4, %v590_v33 }
 0x42f   :  { %v2497_v35 = vpop.eup %1930  ;;  %v613_v36 = vmul.f32 1.442695, %v603_v34 }
 0x430   :  { %627 = vadd.xlane.f32.xlu2 %v2497_v35 }
 0x431   :  { %1932 = vpow2.f32 %v613_v36 }
 0x434   :  { %v592_v13 = vpop.xlane.xlu2 %591 }
 0x435   :  { %v604_v39 = vsub.f32 %v580_v1, %v592_v13 }
 0x437   :  { %v2500_v40 = vpop.eup %1932  ;;  %v615_v41 = vmul.f32 1.442695, %v604_v39 }
 0x438   :  { %629 = vadd.xlane.f32.xlu0 %v2500_v40 }
 0x439   :  { %1934 = vpow2.f32 %v615_v41 }
 0x43c   :  { %v594_v42 = vpop.xlane.xlu0 %593 }
 0x43d   :  { %v605_v43 = vsub.f32 %v581_v12, %v594_v42 }
 0x43f   :  { %v2503_v44 = vpop.eup %1934  ;;  %v617_v45 = vmul.f32 1.442695, %v605_v43 }
 0x440   :  { %631 = vadd.xlane.f32.xlu1 %v2503_v44 }
 0x441   :  { %1936 = vpow2.f32 %v617_v45 }
 0x444   :  { %v596_v19 = vpop.xlane.xlu1 %595 }
 0x445   :  { %v606_v47 = vsub.f32 %v582_v16, %v596_v19 }
 0x447   :  { %v2506_v48 = vpop.eup %1936  ;;  %v619_v49 = vmul.f32 1.442695, %v606_v47 }
 0x448   :  { %633 = vadd.xlane.f32.xlu2 %v2506_v48 }
 0x449   :  { %1938 = vpow2.f32 %v619_v49 }
 0x44c   :  { %v598_v50 = vpop.xlane.xlu2 %597 }
 0x44d   :  { %v607_v51 = vsub.f32 %v583_v20, %v598_v50 }
 0x44f   :  { %v2509_v52 = vpop.eup %1938  ;;  %v621_v54 = vmul.f32 1.442695, %v607_v51 }
 0x450   :  { %635 = vadd.xlane.f32.xlu0 %v2509_v52 }
 0x451   :  { %1940 = vpow2.f32 %v621_v54 }
 0x454   :  { %v600_v25 = vpop.xlane.xlu0 %599 }
 0x455   :  { %v608_v55 = vsub.f32 %v584_v23, %v600_v25 }
 0x457   :  { %v2512_v56 = vpop.eup %1940  ;;  %v623_v31 = vmul.f32 1.442695, %v608_v55 }
 0x458   :  { %637 = vadd.xlane.f32.xlu1 %v2512_v56 }
 0x459   :  { %1942 = vpow2.f32 %v623_v31 }
 0x45f   :  { %v2515_v58 = vpop.eup %1942 }
 0x460   :  { %639 = vadd.xlane.f32.xlu2 %v2515_v58 }
 0x49b   :  { %v626_v59 = vpop.xlane.xlu1 %625 }
 0x49c   :  { %1944 = vrcp.f32 %v626_v59  ;;  %v650_v5 = vand.u32 2147483647, %v626_v59  ;;  %v652_v20 = vand.u32 2147483648, %v626_v59  ;;  %vm646_vm15 = vweird.f32 %v626_v59 }
 0x49e   :  { %vm2550_vm3 = vcmp.eq.f32.partialorder %v650_v5, 8.507059e+37  ;;  %v653_v34 = vor.u32 1.1754944e-38, %v652_v20 }
 0x4a2   :  { %v1945_v63 = vpop.eup %1944 }
 0x4a3   :  { %v628_v60 = vpop.xlane.xlu2 %627  ;;  %v642_v2 = vmul.f32 %v1945_v63, %v626_v59  ;;  %vm647_vm14 = vweird.f32 %v1945_v63 }
 0x4a4   :  { %1946 = vrcp.f32 %v628_v60  ;;  %vm2546_vm0 = vmor %vm646_vm15, %vm647_vm14  ;;  %v664_v43 = vand.u32 2147483647, %v628_v60  ;;  %v666_v45 = vand.u32 2147483648, %v628_v60  ;;  %vm660_vm5 = vweird.f32 %v628_v60 }
 0x4a5   :  { %v643_v6 = vsub.f32 1.0, %v642_v2 }
 0x4a6   :  { %vm665_vm9 = vcmp.eq.f32.partialorder %v664_v43, 8.507059e+37 }
 0x4a7   :  { %v644_v11 = vmul.f32 %v1945_v63, %v643_v6 }
 0x4a9   :  { %v645_v22 = vadd.f32 %v1945_v63, %v644_v11 }
 0x4aa   :  { %v2526_v4 = vpop.eup %1946 }
 0x4ab   :  { %v2518_v62 = vpop.xlane.xlu0 %629  ;;  %v656_v1 = vmul.f32 %v2526_v4, %v628_v60  ;;  %vm661_vm4 = vweird.f32 %v2526_v4  ;;  %v649_v33 = vsel %vm2546_vm0, %v1945_v63, %v645_v22  ;;  %v667_v63 = vor.u32 1.1754944e-38, %v666_v45 }
 0x4ac   :  { %1948 = vrcp.f32 %v2518_v62  ;;  %v678_v19 = vand.u32 2147483647, %v2518_v62  ;;  %v680_v47 = vand.u32 2147483648, %v2518_v62  ;;  %v654_v50 = vsel %vm2550_vm3, %v653_v34, %v649_v33  ;;  %vm2573_vm6 = vmor %vm660_vm5, %vm661_vm4 }
 0x4ad   :  { %v657_v14 = vsub.f32 1.0, %v656_v1  ;;  %vm674_vm10 = vweird.f32 %v2518_v62 }
 0x4ae   :  { %vm2588_vm11 = vcmp.eq.f32.partialorder %v678_v19, 8.507059e+37  ;;  %v681_v1 = vor.u32 1.1754944e-38, %v680_v47 }
 0x4af   :  { %v658_v23 = vmul.f32 %v2526_v4, %v657_v14 }
 0x4b1   :  { %v659_v36 = vadd.f32 %v2526_v4, %v658_v23 }
 0x4b2   :  { %v2529_v7 = vpop.eup %1948 }
 0x4b3   :  { %v2520_v0 = vpop.xlane.xlu1 %631  ;;  %v670_v12 = vmul.f32 %v2529_v7, %v2518_v62  ;;  %vm675_vm7 = vweird.f32 %v2529_v7  ;;  %v663_v60 = vsel %vm2573_vm6, %v2526_v4, %v659_v36 }
 0x4b4   :  { %1950 = vrcp.f32 %v2520_v0  ;;  %v692_v25 = vand.u32 2147483647, %v2520_v0  ;;  %v694_v55 = vand.u32 2147483648, %v2520_v0  ;;  %vm2592_vm12 = vmor %vm674_vm10, %vm675_vm7  ;;  %vm688_vm14 = vweird.f32 %v2520_v0 }
 0x4b5   :  { %v671_v21 = vsub.f32 1.0, %v670_v12  ;;  %v2599_v12 = vmul.f32 %v2494_v30, %v654_v50 }
 0x4b6   :  { %vm2608_vm0 = vcmp.eq.f32.partialorder %v692_v25, 8.507059e+37  ;;  %v695_v5 = vor.u32 1.1754944e-38, %v694_v55 }
 0x4b7   :  { %v672_v32 = vmul.f32 %v2529_v7, %v671_v21 }
 0x4b9   :  { %v673_v54 = vadd.f32 %v2529_v7, %v672_v32 }
 0x4ba   :  { %v2532_v10 = vpop.eup %1950 }
 0x4bb   :  { %v2524_v3 = vpop.xlane.xlu2 %633  ;;  %v684_v15 = vmul.f32 %v2532_v10, %v2520_v0  ;;  %vm689_vm8 = vweird.f32 %v2532_v10  ;;  %v677_v62 = vsel %vm2592_vm12, %v2529_v7, %v673_v54  ;;  %v668_v0 = vsel %vm665_vm9, %v667_v63, %v663_v60 }
 0x4bc   :  { %1952 = vrcp.f32 %v2524_v3  ;;  %vm2604_vm15 = vmor %vm688_vm14, %vm689_vm8  ;;  %vm702_vm4 = vweird.f32 %v2524_v3  ;;  %v706_v22 = vand.u32 2147483647, %v2524_v3  ;;  %v708_v23 = vand.u32 2147483648, %v2524_v3 }
 0x4bd   :  { %v685_v24 = vsub.f32 1.0, %v684_v15  ;;  %v2634_v32 = vmul.f32 %v2497_v35, %v668_v0 }
 0x4be   :  { %vm707_vm9 = vcmp.eq.f32.partialorder %v706_v22, 8.507059e+37 }
 0x4bf   :  { %v686_v13 = vmul.f32 %v2532_v10, %v685_v24  ;;  %v761_v50 = vadd.f32 %v2634_v32, %v2599_v12 }
 0x4c1   :  { %v687_v31 = vadd.f32 %v2532_v10, %v686_v13  ;;  %v709_v13 = vor.u32 1.1754944e-38, %v708_v23 }
 0x4c2   :  { %v2540_v17 = vpop.eup %1952 }
 0x4c3   :  { %v2538_v16 = vpop.xlane.xlu0 %635  ;;  %v698_v26 = vmul.f32 %v2540_v17, %v2524_v3  ;;  %v691_v30 = vsel %vm2604_vm15, %v2532_v10, %v687_v31  ;;  %vm703_vm3 = vweird.f32 %v2540_v17  ;;  %v682_v10 = vsel %vm2588_vm11, %v681_v1, %v677_v62 }
 0x4c4   :  { %1954 = vrcp.f32 %v2538_v16  ;;  %v696_v27 = vsel %vm2608_vm0, %v695_v5, %v691_v30  ;;  %vm2627_vm6 = vmor %vm702_vm4, %vm703_vm3  ;;  %vm716_vm7 = vweird.f32 %v2538_v16  ;;  %v722_v3 = vand.u32 2147483648, %v2538_v16 }
 0x4c5   :  { %v699_v39 = vsub.f32 1.0, %v698_v26  ;;  %v720_v34 = vand.u32 2147483647, %v2538_v16  ;;  %v2646_v43 = vmul.f32 %v2500_v40, %v682_v10 }
 0x4c6   :  { %v723_v47 = vor.u32 1.1754944e-38, %v722_v3 }
 0x4c7   :  { %v700_v59 = vmul.f32 %v2540_v17, %v699_v39  ;;  %vm721_vm14 = vcmp.eq.f32.partialorder %v720_v34, 8.507059e+37 }
 0x4c9   :  { %v701_v20 = vadd.f32 %v2540_v17, %v700_v59 }
 0x4ca   :  { %v2554_v29 = vpop.eup %1954 }
 0x4cb   :  { %v712_v41 = vmul.f32 %v2554_v29, %v2538_v16  ;;  %v2564_v42 = vpop.xlane.xlu1 %637  ;;  %vm717_vm5 = vweird.f32 %v2554_v29  ;;  %v705_v33 = vsel %vm2627_vm6, %v2540_v17, %v701_v20 }
 0x4cc   :  { %1956 = vrcp.f32 %v2564_v42  ;;  %vm2640_vm10 = vmor %vm716_vm7, %vm717_vm5  ;;  %vm730_vm11 = vweird.f32 %v2564_v42  ;;  %v734_v16 = vand.u32 2147483647, %v2564_v42  ;;  %v710_v19 = vsel %vm707_vm9, %v709_v13, %v705_v33 }
 0x4cd   :  { %v713_v49 = vsub.f32 1.0, %v712_v41  ;;  %v736_v41 = vand.u32 2147483648, %v2564_v42  ;;  %v757_v55 = vmul.f32 %v2506_v48, %v710_v19 }
 0x4ce   :  { %vm735_vm15 = vcmp.eq.f32.partialorder %v734_v16, 8.507059e+37 }
 0x4cf   :  { %v714_v11 = vmul.f32 %v2554_v29, %v713_v49  ;;  %v756_v49 = vmul.f32 %v2503_v44, %v696_v27  ;;  %v737_v25 = vor.u32 1.1754944e-38, %v736_v41 }
 0x4d1   :  { %v715_v24 = vadd.f32 %v2554_v29, %v714_v11 }
 0x4d2   :  { %v1957_v4 = vpop.eup %1956 }
 0x4d3   :  { %v726_v7 = vmul.f32 %v1957_v4, %v2564_v42  ;;  %v640_v21 = vpop.xlane.xlu2 %639  ;;  %vm731_vm8 = vweird.f32 %v1957_v4  ;;  %v719_v35 = vsel %vm2640_vm10, %v2554_v29, %v715_v24  ;;  %v762_v29 = vadd.f32 %v761_v50, %v2646_v43 }
 0x4d4   :  { %1958 = vrcp.f32 %v640_v21  ;;  %vm732_vm12 = vmor %vm730_vm11, %vm731_vm8  ;;  %v724_v54 = vsel %vm721_vm14, %v723_v47, %v719_v35  ;;  %v750_v59 = vand.u32 2147483648, %v640_v21  ;;  %v748_v2 = vand.u32 2147483647, %v640_v21 }
 0x4d5   :  { %v727_v26 = vsub.f32 1.0, %v726_v7  ;;  %v763_v60 = vadd.f32 %v762_v29, %v756_v49  ;;  %v758_v63 = vmul.f32 %v2509_v52, %v724_v54  ;;  %vm744_vm3 = vweird.f32 %v640_v21 }
 0x4d6   :  { %vm749_vm5 = vcmp.eq.f32.partialorder %v748_v2, 8.507059e+37 }
 0x4d7   :  { %v728_v36 = vmul.f32 %v1957_v4, %v727_v26  ;;  %v764_v11 = vadd.f32 %v763_v60, %v757_v55 }
 0x4d9   :  { %v729_v17 = vadd.f32 %v1957_v4, %v728_v36  ;;  %v765_v48 = vadd.f32 %v764_v11, %v758_v63 }
 0x4da   :  { %v1959_v45 = vpop.eup %1958 }
 0x4db   :  { %v733_v40 = vsel %vm732_vm12, %v1957_v4, %v729_v17  ;;  %v740_v51 = vmul.f32 %v1959_v45, %v640_v21  ;;  %vm745_vm0 = vweird.f32 %v1959_v45  ;;  %v751_v4 = vor.u32 1.1754944e-38, %v750_v59 }
 0x4dc   :  { %v738_v31 = vsel %vm735_vm15, %v737_v25, %v733_v40  ;;  %vm746_vm4 = vmor %vm744_vm3, %vm745_vm0 }
 0x4dd   :  { %v741_v42 = vsub.f32 1.0, %v740_v51  ;;  %v759_v6 = vmul.f32 %v2512_v56, %v738_v31 }
 0x4df   :  { %v742_v44 = vmul.f32 %v1959_v45, %v741_v42  ;;  %v766_v5 = vadd.f32 %v765_v48, %v759_v6 }
 0x4e1   :  { %v743_v1 = vadd.f32 %v1959_v45, %v742_v44 }
 0x4e3   :  { %v747_v62 = vsel %vm746_vm4, %v1959_v45, %v743_v1 }
 0x4e4   :  { %v752_v14 = vsel %vm749_vm5, %v751_v4, %v747_v62 }
 0x4e5   :  { %v760_v15 = vmul.f32 %v2515_v58, %v752_v14 }
 0x4e7   :  { %v767_v0 = vadd.f32 %v766_v5, %v760_v15 }
 0x4e9   :  { %v768_v30 = vrot.slane %v767_v0, 4 }
 0x4eb   :  { %v769_v52 = vadd.f32 %v768_v30, %v767_v0 }
 0x4ed   :  { %v770_v20 = vrot.slane %v769_v52, 2 }
 0x4ef   :  { %v771_v7 = vadd.f32 %v770_v20, %v769_v52 }
 0x4f1   :  { %v772_v22 = vrot.slane %v771_v7, 1 }
 0x4f3   :  { %v773_v23 = vadd.f32 %v772_v22, %v771_v7 }
 0x4f5   :  { %v774_v56 = vsel %vm439_vm13, %v773_v23, 1.0 }
 0x4f6   :  { %1960 = vrcp.f32 %v774_v56  ;;  %v786_v10 = vand.u32 2147483648, %v774_v56  ;;  %v784_v9 = vand.u32 2147483647, %v774_v56  ;;  %vm780_vm7 = vweird.f32 %v774_v56 }
 0x4f8   :  { %v787_v3 = vor.u32 1.1754944e-38, %v786_v10  ;;  %vm785_vm9 = vcmp.eq.f32.partialorder %v784_v9, 8.507059e+37 }
 0x4fc   :  { %v1961_v21 = vpop.eup %1960 }
 0x4fd   :  { %v776_v24 = vmul.f32 %v1961_v21, %v774_v56  ;;  %vm781_vm6 = vweird.f32 %v1961_v21 }
 0x4fe   :  { %vm782_vm8 = vmor %vm780_vm7, %vm781_vm6 }
 0x4ff   :  { %v777_v26 = vsub.f32 1.0, %v776_v24 }
 0x501   :  { %v778_v27 = vmul.f32 %v1961_v21, %v777_v26 }
 0x503   :  { %v779_v58 = vadd.f32 %v1961_v21, %v778_v27 }
 0x505   :  { %v783_v33 = vsel %vm782_vm8, %v1961_v21, %v779_v58 }
 0x506   :  { %v788_v34 = vsel %vm785_vm9, %v787_v3, %v783_v33 }
 0x507   :  { %v789_v36 = vmul.f32 %v788_v34, %v2599_v12  ;;  %v790_v13 = vmul.f32 %v788_v34, %v2634_v32  ;;  %v791_v39 = vmul.f32 %v788_v34, %v2646_v43  ;;  %v792_v41 = vmul.f32 %v788_v34, %v756_v49 }
 0x508   :  { %v793_v35 = vmul.f32 %v788_v34, %v757_v55  ;;  %v794_v17 = vmul.f32 %v788_v34, %v758_v63  ;;  %v795_v16 = vmul.f32 %v788_v34, %v759_v6  ;;  %v796_v45 = vmul.f32 %v788_v34, %v760_v15 }
 0x509   :  { %797 = vxpose.xlu0.b32.start [1/8] (short) %v789_v36, 128 }
 0x511   :  { %798 = vxpose.xlu0.b32.cont [2/8] (short) %v790_v13, 128 }
 0x519   :  { %799 = vxpose.xlu0.b32.cont [3/8] (short) %v791_v39, 128 }
 0x521   :  { %800 = vxpose.xlu0.b32.cont [4/8] (short) %v792_v41, 128 }
 0x529   :  { %801 = vxpose.xlu0.b32.cont [5/8] (short) %v793_v35, 128 }
 0x531   :  { %802 = vxpose.xlu0.b32.cont [6/8] (short) %v794_v17, 128 }
 0x539   :  { %803 = vxpose.xlu0.b32.cont [7/8] (short) %v795_v16, 128 }
 0x541   :  { %804 = vxpose.xlu0.b32.end [8/8] (short) %v796_v45, 128 }
 0x5ad   :  { %v813_v19 = vpop.trf.xlu0 }
 0x5ae   :  { %1817 = vmatmul.msk.f32.vlgmr.msrb.gmra.mxu2 %vm120_vm1, %v813_v19 }
 0x5b5   :  { %v814_v12 = vpop.trf.xlu0 }
 0x5b6   :  { %1818 = vmatmul.msk.f32.gmra.mxu2 %vm120_vm1, %v814_v12 }
 0x5bd   :  { %v815_v32 = vpop.trf.xlu0 }
 0x5be   :  { %1819 = vmatmul.msk.f32.gmra.mxu2 %vm120_vm1, %v815_v32 }
 0x5c5   :  { %v816_v43 = vpop.trf.xlu0 }
 0x5c6   :  { %1820 = vmatmul.msk.f32.gmra.mxu2 %vm120_vm1, %v816_v43 }
 0x5cd   :  { %v817_v47 = vpop.trf.xlu0 }
 0x5ce   :  { %1821 = vmatmul.msk.f32.gmra.mxu2 %vm120_vm1, %v817_v47 }
 0x5d5   :  { %v818_v49 = vpop.trf.xlu0 }
 0x5d6   :  { %1822 = vmatmul.msk.f32.gmra.mxu2 %vm120_vm1, %v818_v49 }
 0x5dd   :  { %v819_v50 = vpop.trf.xlu0 }
 0x5de   :  { %1823 = vmatmul.msk.f32.gmra.mxu2 %vm120_vm1, %v819_v50 }
 0x5e5   :  { %v820_v40 = vpop.trf.xlu0 }
 0x5e6   :  { %1824 = vmatmul.msk.f32.gmra.mxu2 %vm120_vm1, %v820_v40 }
 0x5ed   :  { %v821_v51 = vpop.trf.xlu0 }
 0x5ee   :  { %1825 = vmatmul.msk.f32.gmra.mxu2 %vm120_vm1, %v821_v51 }
 0x5f5   :  { %v822_v54 = vpop.trf.xlu0 }
 0x5f6   :  { %1826 = vmatmul.msk.f32.gmra.mxu2 %vm120_vm1, %v822_v54 }
 0x5fd   :  { %v823_v25 = vpop.trf.xlu0 }
 0x5fe   :  { %1827 = vmatmul.msk.f32.gmra.mxu2 %vm120_vm1, %v823_v25 }
 0x605   :  { %v824_v29 = vpop.trf.xlu0 }
 0x606   :  { %1828 = vmatmul.msk.f32.gmra.mxu2 %vm120_vm1, %v824_v29 }
 0x60d   :  { %v825_v55 = vpop.trf.xlu0 }
 0x60e   :  { %1829 = vmatmul.msk.f32.gmra.mxu2 %vm120_vm1, %v825_v55 }
 0x615   :  { %v826_v42 = vpop.trf.xlu0 }
 0x616   :  { %1830 = vmatmul.msk.f32.gmra.mxu2 %vm120_vm1, %v826_v42 }
 0x61d   :  { %v827_v31 = vpop.trf.xlu0 }
 0x61e   :  { %1831 = vmatmul.msk.f32.gmra.mxu2 %vm120_vm1, %v827_v31 }
 0x625   :  { %v828_v59 = vpop.trf.xlu0 }
 0x626   :  { %1832 = vmatmul.msk.f32.gmra.mxu2 %vm120_vm1, %v828_v59 }
 0x631   :  { %v894_v60 = vpop.f32.mrf.mxu2 }
 0x639   :  { %v897_v63 = vpop.f32.mrf.mxu2 }
 0x641   :  { %v900_v44 = vpop.f32.mrf.mxu2 }
 0x649   :  { %v903_v2 = vpop.f32.mrf.mxu2 }
 0x651   :  { %v906_v6 = vpop.f32.mrf.mxu2 }
 0x659   :  { %v909_v1 = vpop.f32.mrf.mxu2 }
 0x661   :  { %v912_v11 = vpop.f32.mrf.mxu2 }
 0x669   :  { %v915_v4 = vpop.f32.mrf.mxu2 }
 0x671   :  { %v918_v62 = vpop.f32.mrf.mxu2 }
 0x679   :  { %v921_v48 = vpop.f32.mrf.mxu2 }
 0x681   :  { %v924_v14 = vpop.f32.mrf.mxu2 }
 0x689   :  { %v927_v15 = vpop.f32.mrf.mxu2 }
 0x691   :  { %v930_v5 = vpop.f32.mrf.mxu2 }
 0x699   :  { %v933_v0 = vpop.f32.mrf.mxu2 }
 0x6a1   :  { %v936_v30 = vpop.f32.mrf.mxu2 }
 0x6a9   :  { %v939_v52 = vpop.f32.mrf.mxu2 }
 0x6aa   :  { %1833 = vmatpush.xpose.msk.msrb.mxu1 %vm198_vm2, %v939_v52 }
 0x6ae   :  { %1834 = vmatpush.xpose.msk.msrb.mxu1 %vm198_vm2, %v936_v30 }
 0x6b2   :  { %1835 = vmatpush.xpose.msk.msrb.mxu1 %vm198_vm2, %v933_v0 }
 0x6b6   :  { %1836 = vmatpush.xpose.msk.msrb.mxu1 %vm198_vm2, %v930_v5 }
 0x6ba   :  { %1837 = vmatpush.xpose.msk.msrb.mxu1 %vm198_vm2, %v927_v15 }
 0x6be   :  { %1838 = vmatpush.xpose.msk.msrb.mxu1 %vm198_vm2, %v924_v14 }
 0x6c2   :  { %1839 = vmatpush.xpose.msk.msrb.mxu1 %vm198_vm2, %v921_v48 }
 0x6c6   :  { %1840 = vmatpush.xpose.msk.msrb.mxu1 %vm198_vm2, %v918_v62 }
 0x6ca   :  { %1841 = vmatpush.xpose.msk.msrb.mxu1 %vm198_vm2, %v915_v4 }
 0x6ce   :  { %1842 = vmatpush.xpose.msk.msrb.mxu1 %vm198_vm2, %v912_v11 }
 0x6d2   :  { %1843 = vmatpush.xpose.msk.msrb.mxu1 %vm198_vm2, %v909_v1 }
 0x6d6   :  { %1844 = vmatpush.xpose.msk.msrb.mxu1 %vm198_vm2, %v906_v6 }
 0x6da   :  { %1845 = vmatpush.xpose.msk.msrb.mxu1 %vm198_vm2, %v903_v2 }
 0x6de   :  { %1846 = vmatpush.xpose.msk.msrb.mxu1 %vm198_vm2, %v900_v44 }
 0x6e2   :  { %1847 = vmatpush.xpose.msk.msrb.mxu1 %vm198_vm2, %v897_v63 }
 0x6e6   :  { %1848 = vmatpush.xpose.msk.msrb.mxu1 %vm198_vm2, %v894_v60 }
 0x6e9   :  { %1849 = vmatmul.msk.f32.vlgmr.msrb.gmra.mxu1 %vm198_vm2, %v2420_v61 }
 0x6ea   :  { %1347 = vmatpush.msra.mxu1 %v2455_v57 }
 0x6ec   :  { %1348 = vmatpush.msra.mxu1 %v2450_v53 }
 0x6ee   :  { %1349 = vmatpush.msra.mxu1 %v2445_v46 }
 0x6f0   :  { %1350 = vmatpush.msra.mxu1 %v2440_v38 }
 0x6f1   :  { %1850 = vmatmul.msk.f32.gmra.mxu1 %vm198_vm2, %v2425_v8 }
 0x6f2   :  { %1351 = vmatpush.msra.mxu1 %v2435_v28 }
 0x6f4   :  { %1352 = vmatpush.msra.mxu1 %v2430_v18 }
 0x6f6   :  { %1353 = vmatpush.msra.mxu1 %v2425_v8 }
 0x6f8   :  { %1354 = vmatpush.msra.mxu1 %v2420_v61 }
 0x6f9   :  { %1851 = vmatmul.msk.f32.gmra.mxu1 %vm198_vm2, %v2430_v18 }
 0x701   :  { %1852 = vmatmul.msk.f32.gmra.mxu1 %vm198_vm2, %v2435_v28 }
 0x709   :  { %1853 = vmatmul.msk.f32.gmra.mxu1 %vm198_vm2, %v2440_v38 }
 0x711   :  { %1854 = vmatmul.msk.f32.gmra.mxu1 %vm198_vm2, %v2445_v46 }
 0x719   :  { %1855 = vmatmul.msk.f32.gmra.mxu1 %vm198_vm2, %v2450_v53 }
 0x721   :  { %1856 = vmatmul.msk.f32.gmra.mxu1 %vm198_vm2, %v2455_v57 }
 0x766   :  { %v1007_v20 = vpop.f32.mrf.mxu1 }
 0x767   :  { %v1031_v7 = vmul.f32 50.0, %v1007_v20 }
 0x769   :  { %v1039_v22 = vsel %vm439_vm13, %v1031_v7, -1e+30 }
 0x76a   :  { %1047 = vmax.xlane.f32.xlu1 %v1039_v22 }
 0x76e   :  { %v1010_v23 = vpop.f32.mrf.mxu1 }
 0x76f   :  { %v1032_v56 = vmul.f32 50.0, %v1010_v23 }
 0x771   :  { %v1040_v21 = vsel %vm439_vm13, %v1032_v56, -1e+30 }
 0x772   :  { %1049 = vmax.xlane.f32.xlu2 %v1040_v21 }
 0x776   :  { %v1013_v24 = vpop.f32.mrf.mxu1 }
 0x777   :  { %v1033_v26 = vmul.f32 50.0, %v1013_v24 }
 0x779   :  { %v1041_v10 = vsel %vm439_vm13, %v1033_v26, -1e+30 }
 0x77a   :  { %1051 = vmax.xlane.f32.xlu1 %v1041_v10 }
 0x77e   :  { %v1016_v27 = vpop.f32.mrf.mxu1 }
 0x77f   :  { %v1034_v9 = vmul.f32 50.0, %v1016_v27 }
 0x781   :  { %v1042_v58 = vsel %vm439_vm13, %v1034_v9, -1e+30 }
 0x782   :  { %1053 = vmax.xlane.f32.xlu2 %v1042_v58 }
 0x786   :  { %v1019_v3 = vpop.f32.mrf.mxu1 }
 0x787   :  { %v1035_v33 = vmul.f32 50.0, %v1019_v3 }
 0x789   :  { %v1043_v34 = vsel %vm439_vm13, %v1035_v33, -1e+30 }
 0x78a   :  { %1055 = vmax.xlane.f32.xlu1 %v1043_v34 }
 0x78e   :  { %v1022_v36 = vpop.f32.mrf.mxu1 }
 0x78f   :  { %v1036_v13 = vmul.f32 50.0, %v1022_v36 }
 0x791   :  { %v1044_v39 = vsel %vm439_vm13, %v1036_v13, -1e+30 }
 0x792   :  { %1057 = vmax.xlane.f32.xlu2 %v1044_v39 }
 0x796   :  { %v1025_v41 = vpop.f32.mrf.mxu1 }
 0x797   :  { %v1037_v35 = vmul.f32 50.0, %v1025_v41 }
 0x799   :  { %v1045_v17 = vsel %vm439_vm13, %v1037_v35, -1e+30 }
 0x79a   :  { %1059 = vmax.xlane.f32.xlu1 %v1045_v17 }
 0x79e   :  { %v1028_v16 = vpop.f32.mrf.mxu1 }
 0x79f   :  { %v1038_v45 = vmul.f32 50.0, %v1028_v16 }
 0x7a1   :  { %v1046_v19 = vsel %vm439_vm13, %v1038_v45, -1e+30 }
 0x7a2   :  { %1061 = vmax.xlane.f32.xlu2 %v1046_v19 }
 0x7dd   :  { %v1048_v12 = vpop.xlane.xlu1 %1047 }
 0x7de   :  { %v1063_v32 = vsub.f32 %v1039_v22, %v1048_v12 }
 0x7e0   :  { %v1071_v43 = vmul.f32 1.442695, %v1063_v32 }
 0x7e2   :  { %1962 = vpow2.f32 %v1071_v43 }
 0x7e5   :  { %v1050_v47 = vpop.xlane.xlu2 %1049 }
 0x7e6   :  { %v1064_v49 = vsub.f32 %v1040_v21, %v1050_v47 }
 0x7e8   :  { %v2738_v50 = vpop.eup %1962  ;;  %v1073_v40 = vmul.f32 1.442695, %v1064_v49 }
 0x7e9   :  { %1087 = vadd.xlane.f32.xlu1 %v2738_v50 }
 0x7ea   :  { %1964 = vpow2.f32 %v1073_v40 }
 0x7ed   :  { %v1052_v51 = vpop.xlane.xlu1 %1051 }
 0x7ee   :  { %v1065_v54 = vsub.f32 %v1041_v10, %v1052_v51 }
 0x7f0   :  { %v2741_v25 = vpop.eup %1964  ;;  %v1075_v29 = vmul.f32 1.442695, %v1065_v54 }
 0x7f1   :  { %1089 = vadd.xlane.f32.xlu2 %v2741_v25 }
 0x7f2   :  { %1966 = vpow2.f32 %v1075_v29 }
 0x7f5   :  { %v1054_v55 = vpop.xlane.xlu2 %1053 }
 0x7f6   :  { %v1066_v42 = vsub.f32 %v1042_v58, %v1054_v55 }
 0x7f8   :  { %v2744_v31 = vpop.eup %1966  ;;  %v1077_v59 = vmul.f32 1.442695, %v1066_v42 }
 0x7f9   :  { %1091 = vadd.xlane.f32.xlu1 %v2744_v31 }
 0x7fa   :  { %1968 = vpow2.f32 %v1077_v59 }
 0x7fd   :  { %v1056_v60 = vpop.xlane.xlu1 %1055 }
 0x7fe   :  { %v1067_v63 = vsub.f32 %v1043_v34, %v1056_v60 }
 0x800   :  { %v2747_v44 = vpop.eup %1968  ;;  %v1079_v2 = vmul.f32 1.442695, %v1067_v63 }
 0x801   :  { %1093 = vadd.xlane.f32.xlu2 %v2747_v44 }
 0x802   :  { %1970 = vpow2.f32 %v1079_v2 }
 0x805   :  { %v1058_v6 = vpop.xlane.xlu2 %1057 }
 0x806   :  { %v1068_v1 = vsub.f32 %v1044_v39, %v1058_v6 }
 0x808   :  { %v2750_v11 = vpop.eup %1970  ;;  %v1081_v4 = vmul.f32 1.442695, %v1068_v1 }
 0x809   :  { %1095 = vadd.xlane.f32.xlu1 %v2750_v11 }
 0x80a   :  { %1972 = vpow2.f32 %v1081_v4 }
 0x80d   :  { %v1060_v62 = vpop.xlane.xlu1 %1059 }
 0x80e   :  { %v1069_v48 = vsub.f32 %v1045_v17, %v1060_v62 }
 0x810   :  { %v2753_v14 = vpop.eup %1972  ;;  %v1083_v15 = vmul.f32 1.442695, %v1069_v48 }
 0x811   :  { %1097 = vadd.xlane.f32.xlu2 %v2753_v14 }
 0x812   :  { %1974 = vpow2.f32 %v1083_v15 }
 0x815   :  { %v1062_v5 = vpop.xlane.xlu2 %1061 }
 0x816   :  { %v1070_v0 = vsub.f32 %v1046_v19, %v1062_v5 }
 0x818   :  { %v2756_v30 = vpop.eup %1974  ;;  %v1085_v52 = vmul.f32 1.442695, %v1070_v0 }
 0x819   :  { %1099 = vadd.xlane.f32.xlu1 %v2756_v30 }
 0x81a   :  { %1976 = vpow2.f32 %v1085_v52 }
 0x820   :  { %v2759_v20 = vpop.eup %1976 }
 0x821   :  { %1101 = vadd.xlane.f32.xlu2 %v2759_v20 }
 0x85c   :  { %v1088_v7 = vpop.xlane.xlu1 %1087 }
 0x85d   :  { %1978 = vrcp.f32 %v1088_v7  ;;  %v1112_v35 = vand.u32 2147483647, %v1088_v7  ;;  %v1114_v17 = vand.u32 2147483648, %v1088_v7  ;;  %vm1108_vm11 = vweird.f32 %v1088_v7 }
 0x85f   :  { %vm2794_vm14 = vcmp.eq.f32.partialorder %v1112_v35, 8.507059e+37  ;;  %v1115_v54 = vor.u32 1.1754944e-38, %v1114_v17 }
 0x863   :  { %v1979_v56 = vpop.eup %1978 }
 0x864   :  { %v1090_v22 = vpop.xlane.xlu2 %1089  ;;  %v1104_v24 = vmul.f32 %v1979_v56, %v1088_v7  ;;  %vm1109_vm10 = vweird.f32 %v1979_v56 }
 0x865   :  { %1980 = vrcp.f32 %v1090_v22  ;;  %vm2790_vm12 = vmor %vm1108_vm11, %vm1109_vm10  ;;  %v1126_v63 = vand.u32 2147483647, %v1090_v22  ;;  %v1128_v2 = vand.u32 2147483648, %v1090_v22  ;;  %vm1122_vm0 = vweird.f32 %v1090_v22 }
 0x866   :  { %v1105_v27 = vsub.f32 1.0, %v1104_v24 }
 0x867   :  { %vm1127_vm6 = vcmp.eq.f32.partialorder %v1126_v63, 8.507059e+37 }
 0x868   :  { %v1106_v33 = vmul.f32 %v1979_v56, %v1105_v27 }
 0x86a   :  { %v1107_v45 = vadd.f32 %v1979_v56, %v1106_v33 }
 0x86b   :  { %v2770_v10 = vpop.eup %1980 }
 0x86c   :  { %v2762_v23 = vpop.xlane.xlu1 %1091  ;;  %v1118_v58 = vmul.f32 %v2770_v10, %v1090_v22  ;;  %vm1123_vm15 = vweird.f32 %v2770_v10  ;;  %v1111_v51 = vsel %vm2790_vm12, %v1979_v56, %v1107_v45  ;;  %v1129_v56 = vor.u32 1.1754944e-38, %v1128_v2 }
 0x86d   :  { %1982 = vrcp.f32 %v2762_v23  ;;  %v1140_v6 = vand.u32 2147483647, %v2762_v23  ;;  %v1142_v1 = vand.u32 2147483648, %v2762_v23  ;;  %v1116_v62 = vsel %vm2794_vm14, %v1115_v54, %v1111_v51  ;;  %vm2817_vm3 = vmor %vm1122_vm0, %vm1123_vm15 }
 0x86e   :  { %v1119_v36 = vsub.f32 1.0, %v1118_v58  ;;  %vm1136_vm7 = vweird.f32 %v2762_v23 }
 0x86f   :  { %vm2832_vm8 = vcmp.eq.f32.partialorder %v1140_v6, 8.507059e+37  ;;  %v1143_v58 = vor.u32 1.1754944e-38, %v1142_v1 }
 0x870   :  { %v1120_v19 = vmul.f32 %v2770_v10, %v1119_v36 }
 0x872   :  { %v1121_v29 = vadd.f32 %v2770_v10, %v1120_v19 }
 0x873   :  { %v2773_v9 = vpop.eup %1982 }
 0x874   :  { %v2764_v21 = vpop.xlane.xlu2 %1093  ;;  %v1132_v34 = vmul.f32 %v2773_v9, %v2762_v23  ;;  %vm1137_vm4 = vweird.f32 %v2773_v9  ;;  %v1125_v22 = vsel %vm2817_vm3, %v2770_v10, %v1121_v29 }
 0x875   :  { %1984 = vrcp.f32 %v2764_v21  ;;  %v1154_v5 = vand.u32 2147483647, %v2764_v21  ;;  %v1156_v0 = vand.u32 2147483648, %v2764_v21  ;;  %vm2836_vm9 = vmor %vm1136_vm7, %vm1137_vm4  ;;  %vm1150_vm10 = vweird.f32 %v2764_v21 }
 0x876   :  { %v1133_v16 = vsub.f32 1.0, %v1132_v34  ;;  %v2843_v34 = vmul.f32 %v2738_v50, %v1116_v62 }
 0x877   :  { %vm2852_vm12 = vcmp.eq.f32.partialorder %v1154_v5, 8.507059e+37  ;;  %v1157_v35 = vor.u32 1.1754944e-38, %v1156_v0 }
 0x878   :  { %v1134_v40 = vmul.f32 %v2773_v9, %v1133_v16 }
 0x87a   :  { %v1135_v15 = vadd.f32 %v2773_v9, %v1134_v40 }
 0x87b   :  { %v2776_v3 = vpop.eup %1984 }
 0x87c   :  { %v2768_v26 = vpop.xlane.xlu1 %1095  ;;  %v1146_v13 = vmul.f32 %v2776_v3, %v2764_v21  ;;  %vm1151_vm5 = vweird.f32 %v2776_v3  ;;  %v1139_v23 = vsel %vm2836_vm9, %v2773_v9, %v1135_v15  ;;  %v1130_v21 = vsel %vm1127_vm6, %v1129_v56, %v1125_v22 }
 0x87d   :  { %1986 = vrcp.f32 %v2768_v26  ;;  %vm2848_vm11 = vmor %vm1150_vm10, %vm1151_vm5  ;;  %vm1164_vm15 = vweird.f32 %v2768_v26  ;;  %v1168_v45 = vand.u32 2147483647, %v2768_v26  ;;  %v1170_v19 = vand.u32 2147483648, %v2768_v26 }
 0x87e   :  { %v1147_v12 = vsub.f32 1.0, %v1146_v13  ;;  %v2878_v40 = vmul.f32 %v2741_v25, %v1130_v21 }
 0x87f   :  { %vm1169_vm6 = vcmp.eq.f32.partialorder %v1168_v45, 8.507059e+37 }
 0x880   :  { %v1148_v55 = vmul.f32 %v2776_v3, %v1147_v12  ;;  %v1223_v62 = vadd.f32 %v2878_v40, %v2843_v34 }
 0x882   :  { %v1149_v52 = vadd.f32 %v2776_v3, %v1148_v55  ;;  %v1171_v55 = vor.u32 1.1754944e-38, %v1170_v19 }
 0x883   :  { %v2784_v41 = vpop.eup %1986 }
 0x884   :  { %v2782_v39 = vpop.xlane.xlu2 %1097  ;;  %v1160_v32 = vmul.f32 %v2784_v41, %v2768_v26  ;;  %v1153_v50 = vsel %vm2848_vm11, %v2776_v3, %v1149_v52  ;;  %vm1165_vm14 = vweird.f32 %v2784_v41  ;;  %v1144_v3 = vsel %vm2832_vm8, %v1143_v58, %v1139_v23 }
 0x885   :  { %1988 = vrcp.f32 %v2782_v39  ;;  %v1158_v43 = vsel %vm2852_vm12, %v1157_v35, %v1153_v50  ;;  %vm2871_vm3 = vmor %vm1164_vm15, %vm1165_vm14  ;;  %vm1178_vm4 = vweird.f32 %v2782_v39  ;;  %v1184_v26 = vand.u32 2147483648, %v2782_v39 }
 0x886   :  { %v1161_v42 = vsub.f32 1.0, %v1160_v32  ;;  %v1182_v54 = vand.u32 2147483647, %v2782_v39  ;;  %v2890_v63 = vmul.f32 %v2744_v31, %v1144_v3 }
 0x887   :  { %v1185_v1 = vor.u32 1.1754944e-38, %v1184_v26 }
 0x888   :  { %v1162_v7 = vmul.f32 %v2784_v41, %v1161_v42  ;;  %vm1183_vm10 = vcmp.eq.f32.partialorder %v1182_v54, 8.507059e+37 }
 0x88a   :  { %v1163_v17 = vadd.f32 %v2784_v41, %v1162_v7 }
 0x88b   :  { %v2798_v49 = vpop.eup %1988 }
 0x88c   :  { %v1174_v59 = vmul.f32 %v2798_v49, %v2782_v39  ;;  %v2808_v60 = vpop.xlane.xlu1 %1099  ;;  %vm1179_vm0 = vweird.f32 %v2798_v49  ;;  %v1167_v51 = vsel %vm2871_vm3, %v2784_v41, %v1163_v17 }
 0x88d   :  { %1990 = vrcp.f32 %v2808_v60  ;;  %vm2884_vm7 = vmor %vm1178_vm4, %vm1179_vm0  ;;  %vm1192_vm8 = vweird.f32 %v2808_v60  ;;  %v1196_v39 = vand.u32 2147483647, %v2808_v60  ;;  %v1172_v6 = vsel %vm1169_vm6, %v1171_v55, %v1167_v51 }
 0x88e   :  { %v1175_v4 = vsub.f32 1.0, %v1174_v59  ;;  %v1198_v59 = vand.u32 2147483648, %v2808_v60  ;;  %v1219_v0 = vmul.f32 %v2750_v11, %v1172_v6 }
 0x88f   :  { %vm1197_vm11 = vcmp.eq.f32.partialorder %v1196_v39, 8.507059e+37 }
 0x890   :  { %v1176_v33 = vmul.f32 %v2798_v49, %v1175_v4  ;;  %v1218_v4 = vmul.f32 %v2747_v44, %v1158_v43  ;;  %v1199_v5 = vor.u32 1.1754944e-38, %v1198_v59 }
 0x892   :  { %v1177_v12 = vadd.f32 %v2798_v49, %v1176_v33 }
 0x893   :  { %v1991_v10 = vpop.eup %1990 }
 0x894   :  { %v1188_v9 = vmul.f32 %v1991_v10, %v2808_v60  ;;  %v1102_v16 = vpop.xlane.xlu2 %1101  ;;  %vm1193_vm5 = vweird.f32 %v1991_v10  ;;  %v1181_v25 = vsel %vm2884_vm7, %v2798_v49, %v1177_v12  ;;  %v1224_v49 = vadd.f32 %v1223_v62, %v2890_v63 }
 0x895   :  { %1992 = vrcp.f32 %v1102_v16  ;;  %vm1194_vm9 = vmor %vm1192_vm8, %vm1193_vm5  ;;  %v1186_v15 = vsel %vm1183_vm10, %v1185_v1, %v1181_v25  ;;  %v1212_v7 = vand.u32 2147483648, %v1102_v16  ;;  %v1210_v24 = vand.u32 2147483647, %v1102_v16 }
 0x896   :  { %v1189_v32 = vsub.f32 1.0, %v1188_v9  ;;  %v1225_v22 = vadd.f32 %v1224_v49, %v1218_v4  ;;  %v1220_v56 = vmul.f32 %v2753_v14, %v1186_v15  ;;  %vm1206_vm14 = vweird.f32 %v1102_v16 }
 0x897   :  { %vm1211_vm0 = vcmp.eq.f32.partialorder %v1210_v24, 8.507059e+37 }
 0x898   :  { %v1190_v29 = vmul.f32 %v1991_v10, %v1189_v32  ;;  %v1226_v33 = vadd.f32 %v1225_v22, %v1219_v0 }
 0x89a   :  { %v1191_v41 = vadd.f32 %v1991_v10, %v1190_v29  ;;  %v1227_v11 = vadd.f32 %v1226_v33, %v1220_v56 }
 0x89b   :  { %v1993_v2 = vpop.eup %1992 }
 0x89c   :  { %v1195_v31 = vsel %vm1194_vm9, %v1991_v10, %v1191_v41  ;;  %v1202_v48 = vmul.f32 %v1993_v2, %v1102_v16  ;;  %vm1207_vm12 = vweird.f32 %v1993_v2  ;;  %v1213_v10 = vor.u32 1.1754944e-38, %v1212_v7 }
 0x89d   :  { %v1200_v52 = vsel %vm1197_vm11, %v1199_v5, %v1195_v31  ;;  %vm1208_vm15 = vmor %vm1206_vm14, %vm1207_vm12 }
 0x89e   :  { %v1203_v60 = vsub.f32 1.0, %v1202_v48  ;;  %v1221_v27 = vmul.f32 %v2756_v30, %v1200_v52 }
 0x8a0   :  { %v1204_v44 = vmul.f32 %v1993_v2, %v1203_v60  ;;  %v1228_v35 = vadd.f32 %v1227_v11, %v1221_v27 }
 0x8a2   :  { %v1205_v58 = vadd.f32 %v1993_v2, %v1204_v44 }
 0x8a4   :  { %v1209_v23 = vsel %vm1208_vm15, %v1993_v2, %v1205_v58 }
 0x8a5   :  { %v1214_v36 = vsel %vm1211_vm0, %v1213_v10, %v1209_v23 }
 0x8a6   :  { %v1222_v13 = vmul.f32 %v2759_v20, %v1214_v36 }
 0x8a8   :  { %v1229_v21 = vadd.f32 %v1228_v35, %v1222_v13 }
 0x8aa   :  { %v1230_v50 = vrot.slane %v1229_v21, 4 }
 0x8ac   :  { %v1231_v14 = vadd.f32 %v1230_v50, %v1229_v21 }
 0x8ae   :  { %v1232_v17 = vrot.slane %v1231_v14, 2 }
 0x8b0   :  { %v1233_v9 = vadd.f32 %v1232_v17, %v1231_v14 }
 0x8b2   :  { %v1234_v45 = vrot.slane %v1233_v9, 1 }
 0x8b4   :  { %v1235_v19 = vadd.f32 %v1234_v45, %v1233_v9 }
 0x8b6   :  { %v1236_v30 = vsel %vm439_vm13, %v1235_v19, 1.0 }
 0x8b7   :  { %1994 = vrcp.f32 %v1236_v30  ;;  %v1248_v3 = vand.u32 2147483648, %v1236_v30  ;;  %v1246_v47 = vand.u32 2147483647, %v1236_v30  ;;  %vm1242_vm4 = vweird.f32 %v1236_v30 }
 0x8b9   :  { %v1249_v26 = vor.u32 1.1754944e-38, %v1248_v3  ;;  %vm1247_vm6 = vcmp.eq.f32.partialorder %v1246_v47, 8.507059e+37 }
 0x8bd   :  { %v1995_v16 = vpop.eup %1994 }
 0x8be   :  { %v1238_v12 = vmul.f32 %v1995_v16, %v1236_v30  ;;  %vm1243_vm3 = vweird.f32 %v1995_v16 }
 0x8bf   :  { %vm1244_vm5 = vmor %vm1242_vm4, %vm1243_vm3 }
 0x8c0   :  { %v1239_v32 = vsub.f32 1.0, %v1238_v12 }
 0x8c2   :  { %v1240_v43 = vmul.f32 %v1995_v16, %v1239_v32 }
 0x8c4   :  { %v1241_v20 = vadd.f32 %v1995_v16, %v1240_v43 }
 0x8c6   :  { %v1245_v51 = vsel %vm1244_vm5, %v1995_v16, %v1241_v20 }
 0x8c7   :  { %v1250_v54 = vsel %vm1247_vm6, %v1249_v26, %v1245_v51 }
 0x8c8   :  { %v1251_v29 = vmul.f32 %v1250_v54, %v2843_v34  ;;  %v1252_v55 = vmul.f32 %v1250_v54, %v2878_v40  ;;  %v1253_v42 = vmul.f32 %v1250_v54, %v2890_v63  ;;  %v1254_v59 = vmul.f32 %v1250_v54, %v1218_v4 }
 0x8c9   :  { %v1255_v25 = vmul.f32 %v1250_v54, %v1219_v0  ;;  %v1256_v41 = vmul.f32 %v1250_v54, %v1220_v56  ;;  %v1257_v39 = vmul.f32 %v1250_v54, %v1221_v27  ;;  %v1258_v2 = vmul.f32 %v1250_v54, %v1222_v13 }
 0x8ca   :  { %1259 = vxpose.xlu1.b32.start [1/8] (short) %v1251_v29, 128 }
 0x8d2   :  { %1260 = vxpose.xlu1.b32.cont [2/8] (short) %v1252_v55, 128 }
 0x8da   :  { %1261 = vxpose.xlu1.b32.cont [3/8] (short) %v1253_v42, 128 }
 0x8e2   :  { %1262 = vxpose.xlu1.b32.cont [4/8] (short) %v1254_v59, 128 }
 0x8ea   :  { %1263 = vxpose.xlu1.b32.cont [5/8] (short) %v1255_v25, 128 }
 0x8f2   :  { %1264 = vxpose.xlu1.b32.cont [6/8] (short) %v1256_v41, 128 }
 0x8fa   :  { %1265 = vxpose.xlu1.b32.cont [7/8] (short) %v1257_v39, 128 }
 0x902   :  { %1266 = vxpose.xlu1.b32.end [8/8] (short) %v1258_v2, 128 }
 0x96e   :  { %v1275_v6 = vpop.trf.xlu1 }
 0x96f   :  { %1857 = vmatmul.msk.f32.vlgmr.msra.gmra.mxu1 %vm120_vm1, %v1275_v6 }
 0x976   :  { %v1276_v34 = vpop.trf.xlu1 }
 0x977   :  { %1858 = vmatmul.msk.f32.gmra.mxu1 %vm120_vm1, %v1276_v34 }
 0x97e   :  { %v1277_v40 = vpop.trf.xlu1 }
 0x97f   :  { %1859 = vmatmul.msk.f32.vlgmr.msrb.gmra.mxu3 %vm120_vm1, %v1277_v40 }
 0x986   :  { %v1278_v63 = vpop.trf.xlu1 }
 0x987   :  { %1860 = vmatmul.msk.f32.gmra.mxu3 %vm120_vm1, %v1278_v63 }
 0x98e   :  { %v1279_v1 = vpop.trf.xlu1 }
 0x98f   :  { %1861 = vmatmul.msk.f32.gmra.mxu3 %vm120_vm1, %v1279_v1 }
 0x996   :  { %v1280_v4 = vpop.trf.xlu1 }
 0x997   :  { %1862 = vmatmul.msk.f32.gmra.mxu3 %vm120_vm1, %v1280_v4 }
 0x99e   :  { %v1281_v62 = vpop.trf.xlu1 }
 0x99f   :  { %1863 = vmatmul.msk.f32.gmra.mxu3 %vm120_vm1, %v1281_v62 }
 0x9a6   :  { %v1282_v31 = vpop.trf.xlu1 }
 0x9a7   :  { %1864 = vmatmul.msk.f32.gmra.mxu3 %vm120_vm1, %v1282_v31 }
 0x9ae   :  { %v1283_v48 = vpop.trf.xlu1 }
 0x9af   :  { %1865 = vmatmul.msk.f32.gmra.mxu3 %vm120_vm1, %v1283_v48 }
 0x9b6   :  { %v1284_v15 = vpop.trf.xlu1 }
 0x9b7   :  { %1866 = vmatmul.msk.f32.gmra.mxu3 %vm120_vm1, %v1284_v15 }
 0x9be   :  { %v1285_v5 = vpop.trf.xlu1 }
 0x9bf   :  { %1867 = vmatmul.msk.f32.gmra.mxu3 %vm120_vm1, %v1285_v5 }
 0x9c6   :  { %v1286_v49 = vpop.trf.xlu1 }
 0x9c7   :  { %1868 = vmatmul.msk.f32.gmra.mxu3 %vm120_vm1, %v1286_v49 }
 0x9ce   :  { %v1287_v0 = vpop.trf.xlu1 }
 0x9cf   :  { %1869 = vmatmul.msk.f32.gmra.mxu3 %vm120_vm1, %v1287_v0 }
 0x9d6   :  { %v1288_v60 = vpop.trf.xlu1 }
 0x9d7   :  { %1870 = vmatmul.msk.f32.gmra.mxu3 %vm120_vm1, %v1288_v60 }
 0x9de   :  { %v1289_v52 = vpop.trf.xlu1 }
 0x9df   :  { %1871 = vmatmul.msk.f32.gmra.mxu3 %vm120_vm1, %v1289_v52 }
 0x9e6   :  { %v1290_v7 = vpop.trf.xlu1 }
 0x9e7   :  { %1872 = vmatmul.msk.f32.gmra.mxu3 %vm120_vm1, %v1290_v7 }
 0x9ec   :  { %v1356_v22 = vpop.f32.mrf.mxu1 }
 0x9ed   :  { %1685 = vst.msk [vmem:[%s3089_s7] sm:$0xff] %vm198_vm2, %v1356_v22 }
 0x9f4   :  { %v1359_v56 = vpop.f32.mrf.mxu1 }
 0x9f5   :  { %1686 = vst.msk [vmem:[%s3089_s7 + $0x8] sm:$0xff] %vm198_vm2, %v1359_v56 }
 0xa02   :  { %v1362_v44 = vpop.f32.mrf.mxu3 }
 0xa03   :  { %1687 = vst.msk [vmem:[%s3089_s7 + $0x10] sm:$0xff] %vm198_vm2, %v1362_v44 }
 0xa0a   :  { %v1365_v24 = vpop.f32.mrf.mxu3 }
 0xa0b   :  { %1688 = vst.msk [vmem:[%s3089_s7 + $0x18] sm:$0xff] %vm198_vm2, %v1365_v24 }
 0xa12   :  { %v1368_v27 = vpop.f32.mrf.mxu3 }
 0xa13   :  { %1689 = vst.msk [vmem:[%s3089_s7 + $0x20] sm:$0xff] %vm198_vm2, %v1368_v27 }
 0xa1a   :  { %v1371_v58 = vpop.f32.mrf.mxu3 }
 0xa1b   :  { %1690 = vst.msk [vmem:[%s3089_s7 + $0x28] sm:$0xff] %vm198_vm2, %v1371_v58 }
 0xa22   :  { %v1374_v33 = vpop.f32.mrf.mxu3 }
 0xa23   :  { %1691 = vst.msk [vmem:[%s3089_s7 + $0x30] sm:$0xff] %vm198_vm2, %v1374_v33 }
 0xa2a   :  { %v1377_v10 = vpop.f32.mrf.mxu3 }
 0xa2b   :  { %1692 = vst.msk [vmem:[%s3089_s7 + $0x38] sm:$0xff] %vm198_vm2, %v1377_v10 }
 0xa32   :  { %v1380_v23 = vpop.f32.mrf.mxu3 }
 0xa33   :  { %1693 = vst.msk [vmem:[%s3089_s7 + $0x40] sm:$0xff] %vm198_vm2, %v1380_v23 }
 0xa3a   :  { %v1383_v11 = vpop.f32.mrf.mxu3 }
 0xa3b   :  { %1694 = vst.msk [vmem:[%s3089_s7 + $0x48] sm:$0xff] %vm198_vm2, %v1383_v11 }
 0xa42   :  { %v1386_v36 = vpop.f32.mrf.mxu3 }
 0xa43   :  { %1695 = vst.msk [vmem:[%s3089_s7 + $0x50] sm:$0xff] %vm198_vm2, %v1386_v36 }
 0xa4a   :  { %v1389_v13 = vpop.f32.mrf.mxu3 }
 0xa4b   :  { %1696 = vst.msk [vmem:[%s3089_s7 + $0x58] sm:$0xff] %vm198_vm2, %v1389_v13 }
 0xa52   :  { %v1392_v35 = vpop.f32.mrf.mxu3 }
 0xa53   :  { %1697 = vst.msk [vmem:[%s3089_s7 + $0x60] sm:$0xff] %vm198_vm2, %v1392_v35 }
 0xa5a   :  { %v1395_v21 = vpop.f32.mrf.mxu3 }
 0xa5b   :  { %1698 = vst.msk [vmem:[%s3089_s7 + $0x68] sm:$0xff] %vm198_vm2, %v1395_v21 }
 0xa62   :  { %v1398_v50 = vpop.f32.mrf.mxu3 }
 0xa63   :  { %1699 = vst.msk [vmem:[%s3089_s7 + $0x70] sm:$0xff] %vm198_vm2, %v1398_v50 }
 0xa6a   :  { %v1401_v14 = vpop.f32.mrf.mxu3 }
 0xa6b   :  { %1700 = vst.msk [vmem:[%s3089_s7 + $0x78] sm:$0xff] %vm198_vm2, %v1401_v14  ;;  %1873 = vmatpush.xpose.msk.msra.mxu0 %vm198_vm2, %v1401_v14  ;;  %s2080_s7 = smov [#allocation4]  }
 0xa6c   :  { %s1738_s3 = sshll.u32 %s2080_s7, 4  ;;  %s1739_s3 = int_to_ptr.vmem [resolvable:$true] %s1738_s3 }
 0xa6f   :  { %1874 = vmatpush.xpose.msk.msra.mxu0 %vm198_vm2, %v1398_v50 }
 0xa73   :  { %1875 = vmatpush.xpose.msk.msra.mxu0 %vm198_vm2, %v1395_v21 }
 0xa77   :  { %1876 = vmatpush.xpose.msk.msra.mxu0 %vm198_vm2, %v1392_v35 }
 0xa7b   :  { %1877 = vmatpush.xpose.msk.msra.mxu0 %vm198_vm2, %v1389_v13 }
 0xa7f   :  { %1878 = vmatpush.xpose.msk.msra.mxu0 %vm198_vm2, %v1386_v36 }
 0xa83   :  { %1879 = vmatpush.xpose.msk.msra.mxu0 %vm198_vm2, %v1383_v11 }
 0xa87   :  { %1880 = vmatpush.xpose.msk.msra.mxu0 %vm198_vm2, %v1380_v23 }
 0xa8b   :  { %1881 = vmatpush.xpose.msk.msra.mxu0 %vm198_vm2, %v1377_v10 }
 0xa8f   :  { %1882 = vmatpush.xpose.msk.msra.mxu0 %vm198_vm2, %v1374_v33 }
 0xa93   :  { %1883 = vmatpush.xpose.msk.msra.mxu0 %vm198_vm2, %v1371_v58 }
 0xa97   :  { %1884 = vmatpush.xpose.msk.msra.mxu0 %vm198_vm2, %v1368_v27 }
 0xa9b   :  { %1885 = vmatpush.xpose.msk.msra.mxu0 %vm198_vm2, %v1365_v24 }
 0xa9f   :  { %1886 = vmatpush.xpose.msk.msra.mxu0 %vm198_vm2, %v1362_v44 }
 0xaa3   :  { %1887 = vmatpush.xpose.msk.msra.mxu0 %vm198_vm2, %v1359_v56 }
 0xaa7   :  { %1888 = vmatpush.xpose.msk.msra.mxu0 %vm198_vm2, %v1356_v22 }
 0xaaa   :  { %1889 = vmatmul.msk.f32.vlgmr.msra.gmra.mxu0 %vm198_vm2, %v2420_v61 }
 0xab2   :  { %1890 = vmatmul.msk.f32.gmra.mxu0 %vm198_vm2, %v2425_v8 }
 0xaba   :  { %1891 = vmatmul.msk.f32.gmra.mxu0 %vm198_vm2, %v2430_v18 }
 0xac2   :  { %1892 = vmatmul.msk.f32.gmra.mxu0 %vm198_vm2, %v2435_v28 }
 0xaca   :  { %1893 = vmatmul.msk.f32.gmra.mxu0 %vm198_vm2, %v2440_v38 }
 0xad2   :  { %1894 = vmatmul.msk.f32.gmra.mxu0 %vm198_vm2, %v2445_v46 }
 0xada   :  { %1895 = vmatmul.msk.f32.gmra.mxu0 %vm198_vm2, %v2450_v53 }
 0xae2   :  { %1896 = vmatmul.msk.f32.gmra.mxu0 %vm198_vm2, %v2455_v57 }
 0xb27   :  { %v1469_v61 = vpop.f32.mrf.mxu0 }
 0xb28   :  { %v1493_v8 = vmul.f32 50.0, %v1469_v61  ;;  %1709 = vst [vmem:[#allocation4] sm:$0xff] %v1469_v61 }
 0xb2a   :  { %v1501_v18 = vsel %vm439_vm13, %v1493_v8, -1e+30 }
 0xb2b   :  { %1509 = vmax.xlane.f32.xlu2 %v1501_v18 }
 0xb2f   :  { %v1472_v28 = vpop.f32.mrf.mxu0 }
 0xb30   :  { %v1494_v17 = vmul.f32 50.0, %v1472_v28  ;;  %1710 = vst [vmem:[#allocation4 + $0x8] sm:$0xff] %v1472_v28 }
 0xb32   :  { %v1502_v38 = vsel %vm439_vm13, %v1494_v17, -1e+30 }
 0xb33   :  { %1511 = vmax.xlane.f32.xlu2 %v1502_v38 }
 0xb37   :  { %v1475_v46 = vpop.f32.mrf.mxu0 }
 0xb38   :  { %v1495_v9 = vmul.f32 50.0, %v1475_v46  ;;  %1711 = vst [vmem:[#allocation4 + $0x10] sm:$0xff] %v1475_v46 }
 0xb3a   :  { %v1503_v53 = vsel %vm439_vm13, %v1495_v9, -1e+30 }
 0xb3b   :  { %1513 = vmax.xlane.f32.xlu2 %v1503_v53 }
 0xb3f   :  { %v1478_v57 = vpop.f32.mrf.mxu0 }
 0xb40   :  { %v1496_v45 = vmul.f32 50.0, %v1478_v57  ;;  %1712 = vst [vmem:[#allocation4 + $0x18] sm:$0xff] %v1478_v57 }
 0xb42   :  { %v1504_v19 = vsel %vm439_vm13, %v1496_v45, -1e+30 }
 0xb43   :  { %1515 = vmax.xlane.f32.xlu2 %v1504_v19 }
 0xb47   :  { %v1481_v30 = vpop.f32.mrf.mxu0 }
 0xb48   :  { %v1497_v16 = vmul.f32 50.0, %v1481_v30  ;;  %1713 = vst [vmem:[#allocation4 + $0x20] sm:$0xff] %v1481_v30 }
 0xb4a   :  { %v1505_v12 = vsel %vm439_vm13, %v1497_v16, -1e+30 }
 0xb4b   :  { %1517 = vmax.xlane.f32.xlu2 %v1505_v12 }
 0xb4f   :  { %v1484_v32 = vpop.f32.mrf.mxu0 }
 0xb50   :  { %v1498_v3 = vmul.f32 50.0, %v1484_v32  ;;  %1714 = vst [vmem:[#allocation4 + $0x28] sm:$0xff] %v1484_v32 }
 0xb52   :  { %v1506_v43 = vsel %vm439_vm13, %v1498_v3, -1e+30 }
 0xb53   :  { %1519 = vmax.xlane.f32.xlu0 %v1506_v43 }
 0xb57   :  { %v1487_v47 = vpop.f32.mrf.mxu0 }
 0xb58   :  { %v1499_v20 = vmul.f32 50.0, %v1487_v47  ;;  %1715 = vst [vmem:[#allocation4 + $0x30] sm:$0xff] %v1487_v47 }
 0xb5a   :  { %v1507_v26 = vsel %vm439_vm13, %v1499_v20, -1e+30 }
 0xb5b   :  { %1521 = vmax.xlane.f32.xlu2 %v1507_v26 }
 0xb5f   :  { %v1490_v51 = vpop.f32.mrf.mxu0 }
 0xb60   :  { %v1500_v54 = vmul.f32 50.0, %v1490_v51  ;;  %1716 = vst [vmem:[#allocation4 + $0x38] sm:$0xff] %v1490_v51 }
 0xb61   :  { %1746 = dma.vmem_to_hbm [thread:$0]  %s1739_s3, 1024, %s1741_s15, [#allocation5], %s2081_s5, %s2081_s5, %s2082_s16  }
 0xb62   :  { %v1508_v29 = vsel %vm439_vm13, %v1500_v54, -1e+30 }
 0xb63   :  { %1523 = vmax.xlane.f32.xlu2 %v1508_v29 }
 0xb9e   :  { %v1510_v55 = vpop.xlane.xlu2 %1509 }
 0xb9f   :  { %v1525_v42 = vsub.f32 %v1501_v18, %v1510_v55 }
 0xba1   :  { %v1533_v59 = vmul.f32 1.442695, %v1525_v42 }
 0xba3   :  { %1996 = vpow2.f32 %v1533_v59 }
 0xba6   :  { %v1512_v25 = vpop.xlane.xlu2 %1511 }
 0xba7   :  { %v1526_v41 = vsub.f32 %v1502_v38, %v1512_v25 }
 0xba9   :  { %v3038_v39 = vpop.eup %1996  ;;  %v1535_v2 = vmul.f32 1.442695, %v1526_v41 }
 0xbaa   :  { %1549 = vadd.xlane.f32.xlu2 %v3038_v39 }
 0xbab   :  { %1998 = vpow2.f32 %v1535_v2 }
 0xbae   :  { %v1514_v6 = vpop.xlane.xlu2 %1513 }
 0xbaf   :  { %v1527_v34 = vsub.f32 %v1503_v53, %v1514_v6 }
 0xbb1   :  { %v3041_v40 = vpop.eup %1998  ;;  %v1537_v63 = vmul.f32 1.442695, %v1527_v34 }
 0xbb2   :  { %1551 = vadd.xlane.f32.xlu2 %v3041_v40 }
 0xbb3   :  { %2000 = vpow2.f32 %v1537_v63 }
 0xbb6   :  { %v1516_v37 = vpop.xlane.xlu2 %1515 }
 0xbb7   :  { %v1528_v1 = vsub.f32 %v1504_v19, %v1516_v37 }
 0xbb9   :  { %v3044_v4 = vpop.eup %2000  ;;  %v1539_v62 = vmul.f32 1.442695, %v1528_v1 }
 0xbba   :  { %1553 = vadd.xlane.f32.xlu2 %v3044_v4 }
 0xbbb   :  { %2002 = vpow2.f32 %v1539_v62 }
 0xbbe   :  { %v1518_v31 = vpop.xlane.xlu2 %1517 }
 0xbbf   :  { %v1529_v48 = vsub.f32 %v1505_v12, %v1518_v31 }
 0xbc1   :  { %v3047_v15 = vpop.eup %2002  ;;  %v1541_v5 = vmul.f32 1.442695, %v1529_v48 }
 0xbc2   :  { %1555 = vadd.xlane.f32.xlu2 %v3047_v15 }
 0xbc3   :  { %2004 = vpow2.f32 %v1541_v5 }
 0xbc6   :  { %v1520_v49 = vpop.xlane.xlu0 %1519 }
 0xbc7   :  { %v1530_v0 = vsub.f32 %v1506_v43, %v1520_v49 }
 0xbc9   :  { %v3050_v60 = vpop.eup %2004  ;;  %v1543_v52 = vmul.f32 1.442695, %v1530_v0 }
 0xbca   :  { %1557 = vadd.xlane.f32.xlu2 %v3050_v60 }
 0xbcb   :  { %2006 = vpow2.f32 %v1543_v52 }
 0xbce   :  { %v1522_v7 = vpop.xlane.xlu2 %1521 }
 0xbcf   :  { %v1531_v22 = vsub.f32 %v1507_v26, %v1522_v7 }
 0xbd1   :  { %v3053_v56 = vpop.eup %2006  ;;  %v1545_v44 = vmul.f32 1.442695, %v1531_v22 }
 0xbd2   :  { %1559 = vadd.xlane.f32.xlu2 %v3053_v56 }
 0xbd3   :  { %2008 = vpow2.f32 %v1545_v44 }
 0xbd6   :  { %v1524_v24 = vpop.xlane.xlu2 %1523 }
 0xbd7   :  { %v1532_v27 = vsub.f32 %v1508_v29, %v1524_v24 }
 0xbd9   :  { %v3056_v58 = vpop.eup %2008  ;;  %v1547_v33 = vmul.f32 1.442695, %v1532_v27 }
 0xbda   :  { %1561 = vadd.xlane.f32.xlu2 %v3056_v58 }
 0xbdb   :  { %2010 = vpow2.f32 %v1547_v33 }
 0xbe1   :  { %v3059_v10 = vpop.eup %2010 }
 0xbe2   :  { %1563 = vadd.xlane.f32.xlu2 %v3059_v10 }
 0xc1d   :  { %v1550_v23 = vpop.xlane.xlu2 %1549 }
 0xc1e   :  { %2012 = vrcp.f32 %v1550_v23  ;;  %v1576_v21 = vand.u32 2147483648, %v1550_v23  ;;  %v1574_v14 = vand.u32 2147483647, %v1550_v23  ;;  %vm1570_vm2 = vweird.f32 %v1550_v23 }
 0xc20   :  { %v1577_v18 = vor.u32 1.1754944e-38, %v1576_v21  ;;  %vm1575_vm7 = vcmp.eq.f32.partialorder %v1574_v14, 8.507059e+37 }
 0xc24   :  { %v2013_v11 = vpop.eup %2012 }
 0xc25   :  { %v1566_v36 = vmul.f32 %v2013_v11, %v1550_v23  ;;  %v1552_v13 = vpop.xlane.xlu2 %1551  ;;  %vm1571_vm1 = vweird.f32 %v2013_v11 }
 0xc26   :  { %2014 = vrcp.f32 %v1552_v13  ;;  %vm1572_vm13 = vmor %vm1570_vm2, %vm1571_vm1  ;;  %v1590_v57 = vand.u32 2147483648, %v1552_v13  ;;  %v1588_v19 = vand.u32 2147483647, %v1552_v13  ;;  %vm1584_vm9 = vweird.f32 %v1552_v13 }
 0xc27   :  { %v1567_v35 = vsub.f32 1.0, %v1566_v36 }
 0xc28   :  { %v1591_v12 = vor.u32 1.1754944e-38, %v1590_v57  ;;  %vm1589_vm11 = vcmp.eq.f32.partialorder %v1588_v19, 8.507059e+37 }
 0xc29   :  { %v1568_v50 = vmul.f32 %v2013_v11, %v1567_v35 }
 0xc2b   :  { %v1569_v61 = vadd.f32 %v2013_v11, %v1568_v50 }
 0xc2c   :  { %v2015_v8 = vpop.eup %2014 }
 0xc2d   :  { %v1573_v28 = vsel %vm1572_vm13, %v2013_v11, %v1569_v61  ;;  %v1580_v17 = vmul.f32 %v2015_v8, %v1552_v13  ;;  %v1554_v38 = vpop.xlane.xlu2 %1553  ;;  %vm1585_vm8 = vweird.f32 %v2015_v8 }
 0xc2e   :  { %v1578_v46 = vsel %vm1575_vm7, %v1577_v18, %v1573_v28  ;;  %2016 = vrcp.f32 %v1554_v38  ;;  %vm1586_vm10 = vmor %vm1584_vm9, %vm1585_vm8  ;;  %v1604_v51 = vand.u32 2147483648, %v1554_v38  ;;  %v1602_v29 = vand.u32 2147483647, %v1554_v38 }
 0xc2f   :  { %v1677_v9 = vmul.f32 %v3038_v39, %v1578_v46  ;;  %v1581_v53 = vsub.f32 1.0, %v1580_v17  ;;  %vm1598_vm14 = vweird.f32 %v1554_v38 }
 0xc30   :  { %v1605_v59 = vor.u32 1.1754944e-38, %v1604_v51  ;;  %vm1603_vm0 = vcmp.eq.f32.partialorder %v1602_v29, 8.507059e+37 }
 0xc31   :  { %1701 = vst [vmem:[#allocation2] sm:$0xff] %v1677_v9  ;;  %v1582_v45 = vmul.f32 %v2015_v8, %v1581_v53 }
 0xc33   :  { %v1583_v30 = vadd.f32 %v2015_v8, %v1582_v45 }
 0xc34   :  { %v2017_v16 = vpop.eup %2016 }
 0xc35   :  { %v1587_v32 = vsel %vm1586_vm10, %v2015_v8, %v1583_v30  ;;  %v1594_v3 = vmul.f32 %v2017_v16, %v1554_v38  ;;  %v1556_v43 = vpop.xlane.xlu2 %1555  ;;  %vm1599_vm12 = vweird.f32 %v2017_v16 }
 0xc36   :  { %v1592_v47 = vsel %vm1589_vm11, %v1591_v12, %v1587_v32  ;;  %2018 = vrcp.f32 %v1556_v43  ;;  %vm1600_vm15 = vmor %vm1598_vm14, %vm1599_vm12  ;;  %v1616_v37 = vand.u32 2147483647, %v1556_v43  ;;  %vm1612_vm4 = vweird.f32 %v1556_v43 }
 0xc37   :  { %v1678_v20 = vmul.f32 %v3041_v40, %v1592_v47  ;;  %v1595_v26 = vsub.f32 1.0, %v1594_v3  ;;  %v1618_v40 = vand.u32 2147483648, %v1556_v43 }
 0xc38   :  { %vm1617_vm6 = vcmp.eq.f32.partialorder %v1616_v37, 8.507059e+37 }
 0xc39   :  { %1702 = vst [vmem:[#allocation2 + $0x8] sm:$0xff] %v1678_v20  ;;  %v1596_v54 = vmul.f32 %v2017_v16, %v1595_v26  ;;  %v1619_v31 = vor.u32 1.1754944e-38, %v1618_v40 }
 0xc3b   :  { %v1597_v55 = vadd.f32 %v2017_v16, %v1596_v54 }
 0xc3c   :  { %v2019_v42 = vpop.eup %2018 }
 0xc3d   :  { %v1601_v25 = vsel %vm1600_vm15, %v2017_v16, %v1597_v55  ;;  %v1608_v41 = vmul.f32 %v2019_v42, %v1556_v43  ;;  %v1558_v39 = vpop.xlane.xlu2 %1557  ;;  %vm1613_vm3 = vweird.f32 %v2019_v42 }
 0xc3e   :  { %v1606_v2 = vsel %vm1603_vm0, %v1605_v59, %v1601_v25  ;;  %2020 = vrcp.f32 %v1558_v39  ;;  %vm1614_vm5 = vmor %vm1612_vm4, %vm1613_vm3  ;;  %v1632_v7 = vand.u32 2147483648, %v1558_v39  ;;  %v1630_v44 = vand.u32 2147483647, %v1558_v39 }
 0xc3f   :  { %v1679_v6 = vmul.f32 %v3044_v4, %v1606_v2  ;;  %v1609_v34 = vsub.f32 1.0, %v1608_v41  ;;  %vm1626_vm2 = vweird.f32 %v1558_v39 }
 0xc40   :  { %v1633_v33 = vor.u32 1.1754944e-38, %v1632_v7  ;;  %vm1631_vm7 = vcmp.eq.f32.partialorder %v1630_v44, 8.507059e+37 }
 0xc41   :  { %1703 = vst [vmem:[#allocation2 + $0x10] sm:$0xff] %v1679_v6  ;;  %v1610_v63 = vmul.f32 %v2019_v42, %v1609_v34 }
 0xc43   :  { %v1611_v1 = vadd.f32 %v2019_v42, %v1610_v63 }
 0xc44   :  { %v2021_v62 = vpop.eup %2020 }
 0xc45   :  { %v1615_v48 = vsel %vm1614_vm5, %v2019_v42, %v1611_v1  ;;  %v1622_v5 = vmul.f32 %v2021_v62, %v1558_v39  ;;  %v1560_v49 = vpop.xlane.xlu2 %1559  ;;  %vm1627_vm1 = vweird.f32 %v2021_v62 }
 0xc46   :  { %v1620_v0 = vsel %vm1617_vm6, %v1619_v31, %v1615_v48  ;;  %2022 = vrcp.f32 %v1560_v49  ;;  %vm1628_vm13 = vmor %vm1626_vm2, %vm1627_vm1  ;;  %v1646_v21 = vand.u32 2147483648, %v1560_v49  ;;  %v1644_v14 = vand.u32 2147483647, %v1560_v49 }
 0xc47   :  { %v1680_v52 = vmul.f32 %v3047_v15, %v1620_v0  ;;  %v1623_v4 = vsub.f32 1.0, %v1622_v5  ;;  %vm1640_vm9 = vweird.f32 %v1560_v49 }
 0xc48   :  { %v1647_v18 = vor.u32 1.1754944e-38, %v1646_v21  ;;  %vm1645_vm11 = vcmp.eq.f32.partialorder %v1644_v14, 8.507059e+37 }
 0xc49   :  { %1704 = vst [vmem:[#allocation2 + $0x18] sm:$0xff] %v1680_v52  ;;  %v1624_v22 = vmul.f32 %v2021_v62, %v1623_v4 }
 0xc4b   :  { %v1625_v24 = vadd.f32 %v2021_v62, %v1624_v22 }
 0xc4c   :  { %v2023_v27 = vpop.eup %2022 }
 0xc4d   :  { %v1629_v23 = vsel %vm1628_vm13, %v2021_v62, %v1625_v24  ;;  %v1636_v11 = vmul.f32 %v2023_v27, %v1560_v49  ;;  %v1562_v36 = vpop.xlane.xlu2 %1561  ;;  %vm1641_vm8 = vweird.f32 %v2023_v27 }
 0xc4e   :  { %v1634_v13 = vsel %vm1631_vm7, %v1633_v33, %v1629_v23  ;;  %2024 = vrcp.f32 %v1562_v36  ;;  %vm1642_vm10 = vmor %vm1640_vm9, %vm1641_vm8  ;;  %v1660_v53 = vand.u32 2147483648, %v1562_v36  ;;  %v1658_v45 = vand.u32 2147483647, %v1562_v36 }
 0xc4f   :  { %v1681_v35 = vmul.f32 %v3050_v60, %v1634_v13  ;;  %v1637_v15 = vsub.f32 1.0, %v1636_v11  ;;  %vm1654_vm14 = vweird.f32 %v1562_v36 }
 0xc50   :  { %v1661_v16 = vor.u32 1.1754944e-38, %v1660_v53  ;;  %vm1659_vm0 = vcmp.eq.f32.partialorder %v1658_v45, 8.507059e+37 }
 0xc51   :  { %1705 = vst [vmem:[#allocation2 + $0x20] sm:$0xff] %v1681_v35  ;;  %v1638_v50 = vmul.f32 %v2023_v27, %v1637_v15 }
 0xc53   :  { %v1639_v61 = vadd.f32 %v2023_v27, %v1638_v50 }
 0xc54   :  { %v2025_v8 = vpop.eup %2024 }
 0xc55   :  { %v1643_v28 = vsel %vm1642_vm10, %v2023_v27, %v1639_v61  ;;  %v1650_v17 = vmul.f32 %v2025_v8, %v1562_v36  ;;  %v1564_v38 = vpop.xlane.xlu2 %1563  ;;  %vm1655_vm12 = vweird.f32 %v2025_v8 }
 0xc56   :  { %v1648_v46 = vsel %vm1645_vm11, %v1647_v18, %v1643_v28  ;;  %2026 = vrcp.f32 %v1564_v38  ;;  %vm1656_vm15 = vmor %vm1654_vm14, %vm1655_vm12  ;;  %v1674_v20 = vand.u32 2147483648, %v1564_v38  ;;  %v1672_v26 = vand.u32 2147483647, %v1564_v38 }
 0xc57   :  { %v1682_v9 = vmul.f32 %v3053_v56, %v1648_v46  ;;  %v1651_v60 = vsub.f32 1.0, %v1650_v17  ;;  %vm1668_vm4 = vweird.f32 %v1564_v38 }
 0xc58   :  { %v1675_v54 = vor.u32 1.1754944e-38, %v1674_v20  ;;  %vm1673_vm6 = vcmp.eq.f32.partialorder %v1672_v26, 8.507059e+37 }
 0xc59   :  { %1706 = vst [vmem:[#allocation2 + $0x28] sm:$0xff] %v1682_v9  ;;  %v1652_v57 = vmul.f32 %v2025_v8, %v1651_v60 }
 0xc5b   :  { %v1653_v19 = vadd.f32 %v2025_v8, %v1652_v57 }
 0xc5c   :  { %v2027_v30 = vpop.eup %2026 }
 0xc5d   :  { %v1657_v12 = vsel %vm1656_vm15, %v2025_v8, %v1653_v19  ;;  %v1664_v32 = vmul.f32 %v2027_v30, %v1564_v38  ;;  %vm1669_vm3 = vweird.f32 %v2027_v30 }
 0xc5e   :  { %v1662_v3 = vsel %vm1659_vm0, %v1661_v16, %v1657_v12  ;;  %vm1670_vm5 = vmor %vm1668_vm4, %vm1669_vm3 }
 0xc5f   :  { %v1683_v43 = vmul.f32 %v3056_v58, %v1662_v3  ;;  %v1665_v47 = vsub.f32 1.0, %v1664_v32 }
 0xc61   :  { %1707 = vst [vmem:[#allocation2 + $0x30] sm:$0xff] %v1683_v43  ;;  %v1666_v56 = vmul.f32 %v2027_v30, %v1665_v47 }
 0xc63   :  { %v1667_v51 = vadd.f32 %v2027_v30, %v1666_v56 }
 0xc65   :  { %v1671_v29 = vsel %vm1670_vm5, %v2027_v30, %v1667_v51 }
 0xc66   :  { %v1676_v55 = vsel %vm1673_vm6, %v1675_v54, %v1671_v29 }
 0xc67   :  { %v1684_v58 = vmul.f32 %v3059_v10, %v1676_v55 }
 0xc69   :  { %1708 = vst [vmem:[#allocation2 + $0x38] sm:$0xff] %v1684_v58 }
 0xc6a   :  { %1731 = dma.vmem_to_hbm [thread:$0]  %s1724_s17, 1024, %s1726_s20, [#allocation3], %s2081_s5, %s2081_s5, %s2082_s16  }
 0xc6b   :  { %2076 = dma.done.wait [#allocation3], 1024  }
 0xc6c   :  { %2077 = vsyncadd [#allocation3], 4294966272 }
 0xc6d   :  { %2078 = dma.done.wait [#allocation5], 1024  }
 0xc6e   :  { %2079 = vsyncadd [#allocation5], 4294966272 }
 0xc6f   :  { %1759 = vsyncpa [#allocation3], 1 }
 0xc70   :  { %1760 = vsyncpa [#allocation5], 1 }

</bundles_post_ra>
